<compile_context>
chip_gen: v5e
topology: v5e:2x2
jax: 0.10.0
libtpu: 0.0.40
codegen_flags: <defaults>
</compile_context>

<pallas_src>
import functools

import numpy as np
import jax
import jax.numpy as jnp
from jax.experimental import pallas as pl
from jax.experimental.pallas import tpu as pltpu


def _round_up(x, m):
    return (x + m - 1) // m * m


def _pick_divisor(total, max_blk):
    """Largest multiple-of-8 divisor of `total` that is <= max_blk (fallback: total)."""
    t = min(max_blk, total)
    t -= t % 8
    while t >= 8:
        if total % t == 0:
            return t
        t -= 8
    return total


# ---------------------------------------------------------------------------
# Kernel 1: 3x3 stride-2 conv + bias + ReLU via 9 in-kernel accumulating
#           bf16 matmuls over stride-2 phase slabs (no host im2col).
# ---------------------------------------------------------------------------
def _conv_kernel(ph_ref, w_ref, b_ref, o_ref, *, taps, mlen):
    # ph_ref: (1, 4, Cin, Lp) bf16   (four stride-2 phases, spatially flattened)
    # w_ref : (9, Ct, Cin)    bf16   (one (Ct, Cin) slab per tap)
    # b_ref : (Ct, 1)         f32
    # o_ref : (1, Ct, Mext)   f32    (Mext = ho * (wo + 1), lane-dense)
    acc = None
    for t, (pidx, start) in enumerate(taps):
        x = ph_ref[0, pidx, :, pl.ds(start, mlen)]             # (Cin, Mext) bf16
        wt = w_ref[t]                                          # (Ct, Cin)  bf16
        p = jnp.dot(wt, x, preferred_element_type=jnp.float32)
        acc = p if acc is None else acc + p
    o_ref[0] = jnp.maximum(acc + b_ref[...], 0.0)


def conv3x3_s2_relu(x, w9, bias):
    """3x3 conv, stride 2, pad 1, + ReLU.

    x   : (N, Cin, H, W)  float32 (H, W even)
    w9  : (9, Cout, Cin)  bfloat16   (tap-major weights)
    bias: (Cout, 1)       float32
    returns (N, Cout, H//2, W//2) float32
    """
    n, cin, hgt, wid = x.shape
    assert hgt % 2 == 0 and wid % 2 == 0, "even spatial dims required"
    cout = w9.shape[1]
    ho, wo = hgt // 2, wid // 2
    we = wo + 1                                   # extended width (1 garbage col/row)
    lp = (ho + 1) * we + 1                        # flattened phase length (+1 overrun pad)
    mext = ho * we

    # Stride-2 phase split: same element count as the input (no 9x inflation).
    xp = jnp.pad(x, ((0, 0), (0, 0), (1, 1), (1, 1)))
    ph = jnp.stack([xp[:, :, a::2, b2::2] for a in (0, 1) for b2 in (0, 1)], axis=1)
    ph = ph.reshape(n, 4, cin, (ho + 1) * we)
    ph = jnp.pad(ph, ((0, 0), (0, 0), (0, 0), (0, 1))).astype(jnp.bfloat16)

    # tap -> (phase index, flat start offset) for a contiguous length-mext slice
    taps = []
    for i in range(3):
        for j in range(3):
            taps.append(((i % 2) * 2 + (j % 2), (i // 2) * we + (j // 2)))

    tc = cout if cout <= 256 else 256             # fill the 256-wide MXU on v6e/v7x
    assert cout % tc == 0

    kernel = functools.partial(_conv_kernel, taps=tuple(taps), mlen=mext)
    out = pl.pallas_call(
        kernel,
        grid=(n, cout // tc),                     # Cout innermost -> phase block reused
        in_specs=[
            pl.BlockSpec((1, 4, cin, lp), lambda nb, co: (nb, 0, 0, 0)),
            pl.BlockSpec((9, tc, cin), lambda nb, co: (0, co, 0)),
            pl.BlockSpec((tc, 1), lambda nb, co: (co, 0)),
        ],
        out_specs=pl.BlockSpec((1, tc, mext), lambda nb, co: (nb, co, 0)),
        out_shape=jax.ShapeDtypeStruct((n, cout, mext), jnp.float32),
        compiler_params=pltpu.CompilerParams(
            dimension_semantics=("parallel", "parallel"),
            vmem_limit_bytes=48 * 1024 * 1024,
        ),
    )(ph, w9, bias)
    return out.reshape(n, cout, ho, we)[..., :wo]  # strip the garbage column


# ---------------------------------------------------------------------------
# Kernel 2: Mahalanobis distance  sqrt(clamp(delta^T Sigma^-1 delta, 0))
#   per-pixel icov(Cp,Cp) @ delta(Cp,B); icov streamed bf16, math/accum f32.
# ---------------------------------------------------------------------------
def _maha_kernel(delta_ref, icov_ref, out_ref):
    delta = delta_ref[...]                                      # (P, Cp, B) f32
    md = jnp.einsum('pcd,pdb->pcb', icov_ref[...],
                    delta.astype(jnp.bfloat16),
                    preferred_element_type=jnp.float32)         # (P, Cp, B) f32
    dist = jnp.sum(md * delta, axis=1)                          # (P, B)
    out_ref[...] = jnp.sqrt(jnp.maximum(dist, 0.0))


def mahalanobis_distance(embedding, mean, icov_bf16):
    """embedding: (N, C, h, w) f32, mean: (C, h*w) f32,
    icov_bf16: (h*w, Cp, Cp) bf16 (pre-padded, pre-cast) -> (N, 1, h, w)."""
    n, c, h, w = embedding.shape
    hw = h * w
    cp = icov_bf16.shape[-1]
    # mean subtraction + pad + transpose is a cheap pass over the small embedding
    delta = embedding.reshape(n, c, hw) - mean[None]
    delta = jnp.pad(delta, ((0, 0), (0, cp - c), (0, 0)))
    delta = jnp.transpose(delta, (2, 1, 0))                     # (HW, Cp, N)

    max_blk = min(256, hw // 2) if hw >= 16 else hw             # >=2 blocks for megacore
    p_blk = _pick_divisor(hw, max_blk)

    out = pl.pallas_call(
        _maha_kernel,
        grid=(hw // p_blk,),
        in_specs=[
            pl.BlockSpec((p_blk, cp, n), lambda i: (i, 0, 0)),
            pl.BlockSpec((p_blk, cp, cp), lambda i: (i, 0, 0)),
        ],
        out_specs=pl.BlockSpec((p_blk, n), lambda i: (i, 0)),
        out_shape=jax.ShapeDtypeStruct((hw, n), jnp.float32),
        compiler_params=pltpu.CompilerParams(
            dimension_semantics=("parallel",),
            vmem_limit_bytes=32 * 1024 * 1024,
        ),
    )(delta, icov_bf16)
    return out.T.reshape(n, 1, h, w)               # tiny (HW, B) host transpose


# ---------------------------------------------------------------------------
# Kernel 3: fused bilinear upsample + Gaussian blur as two bf16 matmuls,
#           tiled over (batch, output row blocks), lane dim padded to 128.
# ---------------------------------------------------------------------------
def _amap_kernel(dist_ref, mh_ref, mwt_ref, o_ref):
    d = dist_ref[0].astype(jnp.bfloat16)                                   # (h, w)
    up = jnp.dot(mh_ref[...], d, preferred_element_type=jnp.float32)       # (tr, w)
    o_ref[0] = jnp.dot(up.astype(jnp.bfloat16), mwt_ref[...],
                       preferred_element_type=jnp.float32)                 # (tr, Wp)


def anomaly_map_and_score(dist, m_h, m_wt, out_w):
    """dist: (B,1,h,w), m_h: (H,h) bf16, m_wt: (w,Wp) bf16 -> (map (B,1,H,W), score (B,1))."""
    b, _, h, w = dist.shape
    big_h = m_h.shape[0]
    wp = m_wt.shape[1]
    tr = _pick_divisor(big_h, min(128, big_h // 2) if big_h >= 16 else big_h)

    amap = pl.pallas_call(
        _amap_kernel,
        grid=(b, big_h // tr),
        in_specs=[
            pl.BlockSpec((1, h, w), lambda i, r: (i, 0, 0)),
            pl.BlockSpec((tr, h), lambda i, r: (r, 0)),
            pl.BlockSpec((w, wp), lambda i, r: (0, 0)),
        ],
        out_specs=pl.BlockSpec((1, tr, wp), lambda i, r: (i, r, 0)),
        out_shape=jax.ShapeDtypeStruct((b, big_h, wp), jnp.float32),
        compiler_params=pltpu.CompilerParams(
            dimension_semantics=("parallel", "parallel"),
            vmem_limit_bytes=32 * 1024 * 1024,
        ),
    )(dist.reshape(b, h, w), m_h, m_wt)
    amap = amap[:, :, :out_w].reshape(b, 1, big_h, out_w)
    score = jnp.max(amap.reshape(b, -1), axis=-1, keepdims=True)  # torch.amax(-2,-1)
    return amap, score


# ---------------------------------------------------------------------------
# Host-side linear operators: F.interpolate(bilinear) and GaussianBlur2d
# (sigma=4, reflect padding) are separable linear maps -> folded into kernel 3.
# ---------------------------------------------------------------------------
def _bilinear_matrix(out_size, in_size):
    m = np.zeros((out_size, in_size), dtype=np.float32)
    scale = in_size / out_size
    for o in range(out_size):
        src = max((o + 0.5) * scale - 0.5, 0.0)   # align_corners=False
        i0 = int(np.floor(src))
        i1 = min(i0 + 1, in_size - 1)
        frac = src - i0
        m[o, i0] += 1.0 - frac
        m[o, i1] += frac
    return m


def _gaussian_blur_matrix(size, sigma):
    ksize = 2 * int(4.0 * sigma + 0.5) + 1        # = 33 for sigma=4
    half = ksize // 2
    xs = np.arange(ksize, dtype=np.float64) - half
    g = np.exp(-0.5 * (xs / sigma) ** 2)
    g = (g / g.sum()).astype(np.float32)
    m = np.zeros((size, size), dtype=np.float32)
    for o in range(size):
        for k in range(ksize):
            idx = o + k - half
            if idx < 0:                           # PyTorch 'reflect' padding
                idx = -idx
            elif idx >= size:
                idx = 2 * size - 2 - idx
            m[o, idx] += g[k]
    return m


# ---------------------------------------------------------------------------
# PaDiM model (inference forward)
# ---------------------------------------------------------------------------
class PadimPallas:
    def __init__(self, key, n_features=100):
        # synthetic stand-in for timm resnet18 layer1/2/3 (64/128/256 @ H/4,H/8,H/16)
        dims = [(3, 64), (64, 64), (64, 128), (128, 256)]  # stem, layer1, layer2, layer3
        keys = jax.random.split(key, 2 * len(dims) + 2)
        self.conv_w9, self.conv_b = [], []
        for i, (cin, cout) in enumerate(dims):
            w = jax.random.normal(keys[2 * i], (cout, cin, 3, 3), jnp.float32)
            w = w * (2.0 / (cin * 9)) ** 0.5 * 0.5
            b = 0.01 * jax.random.normal(keys[2 * i + 1], (cout,), jnp.float32)
            # pre-cast weights once: (9, Cout, Cin) bf16, tap-major
            w9 = jnp.transpose(w, (2, 3, 0, 1)).reshape(9, cout, cin).astype(jnp.bfloat16)
            self.conv_w9.append(w9)
            self.conv_b.append(b.reshape(cout, 1))

        self.n_features_original = 64 + 128 + 256            # 448
        self.n_features = n_features
        assert 0 < self.n_features <= self.n_features_original
        # deterministic stand-in for random.sample(range(448), 100)
        rs = np.random.RandomState(0)
        idx_np = rs.choice(self.n_features_original, n_features, replace=False).astype(np.int64)
        # per-layer split (select BEFORE upsample/concat) + permutation restoring idx order
        layer_of = np.where(idx_np < 64, 0, np.where(idx_np < 192, 1, 2))
        order = np.argsort(layer_of, kind='stable')
        ordered = idx_np[order]
        self.idx_l1 = jnp.asarray(ordered[ordered < 64].astype(np.int32))
        self.idx_l2 = jnp.asarray((ordered[(ordered >= 64) & (ordered < 192)] - 64).astype(np.int32))
        self.idx_l3 = jnp.asarray((ordered[ordered >= 192] - 192).astype(np.int32))
        self.inv_order = jnp.asarray(np.argsort(order).astype(np.int32))

        self._gkeys = keys[-2:]
        self.sigma = 4.0
        self._gauss_cache = {}
        self._amap_cache = {}

    # -- cached Gaussian buffers (pre-padded, pre-cast; NOT rebuilt per forward) --
    def _gaussian_buffers(self, h, w):
        # TODO(synk): in the real model these come from MultiVariateGaussian.fit();
        # here they are synthetic SPD buffers generated once and cached.
        key = (h, w)
        if key not in self._gauss_cache:
            hw, c = h * w, self.n_features
            cp = _round_up(c, 8)                              # 100 -> 104 (sublane align)
            mean = 0.1 * jax.random.normal(self._gkeys[0], (c, hw), jnp.float32)
            a = 0.1 * jax.random.normal(self._gkeys[1], (hw, c, c), jnp.float32)
            inv_cov = (jnp.einsum('pij,pkj->pik', a, a) / c
                       + 0.05 * jnp.eye(c, dtype=jnp.float32)[None])
            icov = jnp.pad(inv_cov, ((0, 0), (0, cp - c), (0, cp - c))).astype(jnp.bfloat16)
            self._gauss_cache[key] = (mean, icov)
        return self._gauss_cache[key]

    # -- cached upsample+blur operators (bf16) --
    def _amap_operators(self, output_size, h, w):
        key = (int(output_size[0]), int(output_size[1]), h, w)
        if key not in self._amap_cache:
            mh = _gaussian_blur_matrix(output_size[0], self.sigma) @ _bilinear_matrix(output_size[0], h)
            mw = _gaussian_blur_matrix(output_size[1], self.sigma) @ _bilinear_matrix(output_size[1], w)
            wp = _round_up(output_size[1], 128)
            mwt = np.zeros((w, wp), np.float32)
            mwt[:, :output_size[1]] = mw.T
            self._amap_cache[key] = (jnp.asarray(mh, jnp.bfloat16),
                                     jnp.asarray(mwt, jnp.bfloat16))
        return self._amap_cache[key]

    def extract_features(self, x):
        """x: (N, C, H, W)."""
        f = conv3x3_s2_relu(x, self.conv_w9[0], self.conv_b[0])    # stem   H/2
        l1 = conv3x3_s2_relu(f, self.conv_w9[1], self.conv_b[1])   # layer1 H/4,  64
        l2 = conv3x3_s2_relu(l1, self.conv_w9[2], self.conv_b[2])  # layer2 H/8, 128
        l3 = conv3x3_s2_relu(l2, self.conv_w9[3], self.conv_b[3])  # layer3 H/16,256
        return {'layer1': l1, 'layer2': l2, 'layer3': l3}

    def generate_embedding(self, features):
        l1 = features['layer1']                                    # (N, 64, h, w)
        h = l1.shape[-2]
        parts = [jnp.take(l1, self.idx_l1, axis=1)]
        for name, idxs in (('layer2', self.idx_l2), ('layer3', self.idx_l3)):
            f = jnp.take(features[name], idxs, axis=1)             # select BEFORE upsample
            factor = h // f.shape[-2]
            f = jnp.repeat(jnp.repeat(f, factor, axis=-2), factor, axis=-1)  # nearest
            parts.append(f)
        emb = jnp.concatenate(parts, axis=1)                       # (N, 100, h, w) grouped
        return jnp.take(emb, self.inv_order, axis=1)               # restore idx order

    def forward(self, x):
        output_size = x.shape[-2:]
        features = self.extract_features(x)
        embeddings = self.generate_embedding(features)             # (N, 100, h, w)
        _, _, h, w = embeddings.shape
        mean, icov_bf16 = self._gaussian_buffers(h, w)
        dist = mahalanobis_distance(embeddings, mean, icov_bf16)   # (N, 1, h, w)
        m_h, m_wt = self._amap_operators(output_size, h, w)
        anomaly_map, pred_score = anomaly_map_and_score(dist, m_h, m_wt, output_size[1])
        return pred_score, anomaly_map                             # InferenceBatch fields


if __name__ == "__main__":
    key = jax.random.PRNGKey(0)
    kx, kp = jax.random.split(key)
    x = jax.random.normal(kx, (2, 3, 32, 32), jnp.float32)         # (N, C, H, W)
    model = PadimPallas(kp)
    pred_score, anomaly_map = model.forward(x)
    pred_score, anomaly_map = jax.block_until_ready((pred_score, anomaly_map))
    assert pred_score.shape == (2, 1)
    assert anomaly_map.shape == (2, 1, 32, 32)
    assert bool(jnp.all(jnp.isfinite(anomaly_map))) and bool(jnp.all(jnp.isfinite(pred_score)))
    print("KERNEL_OK")
</pallas_src>

<mosaic_0001>
module attributes {stable_mosaic.version = 11 : i64} {
  func.func @_conv_kernel(%arg0: i32, %arg1: i32, %arg2: memref<1x4x3x290xbf16, #tpu.memory_space<vmem>>, %arg3: memref<9x64x3xbf16, #tpu.memory_space<vmem>>, %arg4: memref<64x1xf32, #tpu.memory_space<vmem>>, %arg5: memref<1x64x272xf32, #tpu.memory_space<vmem>>) attributes {dimension_semantics = [#tpu.dimension_semantics<parallel>, #tpu.dimension_semantics<parallel>], iteration_bounds = array<i64: 2, 1>, scalar_prefetch = 0 : i64, scratch_operands = 0 : i64, tpu.core_type = #tpu.core_type<tc>, window_params = [{transform_indices = @transform_0, window_bounds = array<i64: 1, 4, 3, 290>}, {transform_indices = @transform_1, window_bounds = array<i64: 9, 64, 3>}, {transform_indices = @transform_2, window_bounds = array<i64: 64, 1>}, {transform_indices = @transform_3, window_bounds = array<i64: 1, 64, 272>}]} {
    %c0 = arith.constant 0 : index
    %c0_0 = arith.constant 0 : index
    %c0_1 = arith.constant 0 : index
    %c0_2 = arith.constant 0 : index
    %0 = vector.load %arg2[%c0, %c0_0, %c0_1, %c0_2] : memref<1x4x3x290xbf16, #tpu.memory_space<vmem>>, vector<1x1x3x272xbf16>
    %1 = vector.shape_cast %0 : vector<1x1x3x272xbf16> to vector<3x272xbf16>
    %c0_3 = arith.constant 0 : index
    %c0_4 = arith.constant 0 : index
    %c0_5 = arith.constant 0 : index
    %2 = vector.load %arg3[%c0_3, %c0_4, %c0_5] : memref<9x64x3xbf16, #tpu.memory_space<vmem>>, vector<1x64x3xbf16>
    %3 = vector.shape_cast %2 : vector<1x64x3xbf16> to vector<64x3xbf16>
    %cst = arith.constant dense<0.000000e+00> : vector<64x272xf32>
    %4 = tpu.matmul %3, %1, %cst {dimension_numbers = #tpu.dot_dimension_numbers<[1], [0], [0], [1], [0, 0, 1, 1], [], []>} : vector<64x3xbf16>, vector<3x272xbf16>, vector<64x272xf32> -> vector<64x272xf32>
    %c0_6 = arith.constant 0 : index
    %c1 = arith.constant 1 : index
    %c0_7 = arith.constant 0 : index
    %c0_8 = arith.constant 0 : index
    %5 = vector.load %arg2[%c0_6, %c1, %c0_7, %c0_8] : memref<1x4x3x290xbf16, #tpu.memory_space<vmem>>, vector<1x1x3x272xbf16>
    %6 = vector.shape_cast %5 : vector<1x1x3x272xbf16> to vector<3x272xbf16>
    %c1_9 = arith.constant 1 : index
    %c0_10 = arith.constant 0 : index
    %c0_11 = arith.constant 0 : index
    %7 = vector.load %arg3[%c1_9, %c0_10, %c0_11] : memref<9x64x3xbf16, #tpu.memory_space<vmem>>, vector<1x64x3xbf16>
    %8 = vector.shape_cast %7 : vector<1x64x3xbf16> to vector<64x3xbf16>
    %cst_12 = arith.constant dense<0.000000e+00> : vector<64x272xf32>
    %9 = tpu.matmul %8, %6, %cst_12 {dimension_numbers = #tpu.dot_dimension_numbers<[1], [0], [0], [1], [0, 0, 1, 1], [], []>} : vector<64x3xbf16>, vector<3x272xbf16>, vector<64x272xf32> -> vector<64x272xf32>
    %10 = arith.addf %4, %9 : vector<64x272xf32>
    %c0_13 = arith.constant 0 : index
    %c0_14 = arith.constant 0 : index
    %c0_15 = arith.constant 0 : index
    %c1_16 = arith.constant 1 : index
    %11 = vector.load %arg2[%c0_13, %c0_14, %c0_15, %c1_16] : memref<1x4x3x290xbf16, #tpu.memory_space<vmem>>, vector<1x1x3x272xbf16>
    %12 = vector.shape_cast %11 : vector<1x1x3x272xbf16> to vector<3x272xbf16>
    %c2 = arith.constant 2 : index
    %c0_17 = arith.constant 0 : index
    %c0_18 = arith.constant 0 : index
    %13 = vector.load %arg3[%c2, %c0_17, %c0_18] : memref<9x64x3xbf16, #tpu.memory_space<vmem>>, vector<1x64x3xbf16>
    %14 = vector.shape_cast %13 : vector<1x64x3xbf16> to vector<64x3xbf16>
    %cst_19 = arith.constant dense<0.000000e+00> : vector<64x272xf32>
    %15 = tpu.matmul %14, %12, %cst_19 {dimension_numbers = #tpu.dot_dimension_numbers<[1], [0], [0], [1], [0, 0, 1, 1], [], []>} : vector<64x3xbf16>, vector<3x272xbf16>, vector<64x272xf32> -> vector<64x272xf32>
    %16 = arith.addf %10, %15 : vector<64x272xf32>
    %c0_20 = arith.constant 0 : index
    %c2_21 = arith.constant 2 : index
    %c0_22 = arith.constant 0 : index
    %c0_23 = arith.constant 0 : index
    %17 = vector.load %arg2[%c0_20, %c2_21, %c0_22, %c0_23] : memref<1x4x3x290xbf16, #tpu.memory_space<vmem>>, vector<1x1x3x272xbf16>
    %18 = vector.shape_cast %17 : vector<1x1x3x272xbf16> to vector<3x272xbf16>
    %c3 = arith.constant 3 : index
    %c0_24 = arith.constant 0 : index
    %c0_25 = arith.constant 0 : index
    %19 = vector.load %arg3[%c3, %c0_24, %c0_25] : memref<9x64x3xbf16, #tpu.memory_space<vmem>>, vector<1x64x3xbf16>
    %20 = vector.shape_cast %19 : vector<1x64x3xbf16> to vector<64x3xbf16>
    %cst_26 = arith.constant dense<0.000000e+00> : vector<64x272xf32>
    %21 = tpu.matmul %20, %18, %cst_26 {dimension_numbers = #tpu.dot_dimension_numbers<[1], [0], [0], [1], [0, 0, 1, 1], [], []>} : vector<64x3xbf16>, vector<3x272xbf16>, vector<64x272xf32> -> vector<64x272xf32>
    %22 = arith.addf %16, %21 : vector<64x272xf32>
    %c0_27 = arith.constant 0 : index
    %c3_28 = arith.constant 3 : index
    %c0_29 = arith.constant 0 : index
    %c0_30 = arith.constant 0 : index
    %23 = vector.load %arg2[%c0_27, %c3_28, %c0_29, %c0_30] : memref<1x4x3x290xbf16, #tpu.memory_space<vmem>>, vector<1x1x3x272xbf16>
    %24 = vector.shape_cast %23 : vector<1x1x3x272xbf16> to vector<3x272xbf16>
    %c4 = arith.constant 4 : index
    %c0_31 = arith.constant 0 : index
    %c0_32 = arith.constant 0 : index
    %25 = vector.load %arg3[%c4, %c0_31, %c0_32] : memref<9x64x3xbf16, #tpu.memory_space<vmem>>, vector<1x64x3xbf16>
    %26 = vector.shape_cast %25 : vector<1x64x3xbf16> to vector<64x3xbf16>
    %cst_33 = arith.constant dense<0.000000e+00> : vector<64x272xf32>
    %27 = tpu.matmul %26, %24, %cst_33 {dimension_numbers = #tpu.dot_dimension_numbers<[1], [0], [0], [1], [0, 0, 1, 1], [], []>} : vector<64x3xbf16>, vector<3x272xbf16>, vector<64x272xf32> -> vector<64x272xf32>
    %28 = arith.addf %22, %27 : vector<64x272xf32>
    %c0_34 = arith.constant 0 : index
    %c2_35 = arith.constant 2 : index
    %c0_36 = arith.constant 0 : index
    %c1_37 = arith.constant 1 : index
    %29 = vector.load %arg2[%c0_34, %c2_35, %c0_36, %c1_37] : memref<1x4x3x290xbf16, #tpu.memory_space<vmem>>, vector<1x1x3x272xbf16>
    %30 = vector.shape_cast %29 : vector<1x1x3x272xbf16> to vector<3x272xbf16>
    %c5 = arith.constant 5 : index
    %c0_38 = arith.constant 0 : index
    %c0_39 = arith.constant 0 : index
    %31 = vector.load %arg3[%c5, %c0_38, %c0_39] : memref<9x64x3xbf16, #tpu.memory_space<vmem>>, vector<1x64x3xbf16>
    %32 = vector.shape_cast %31 : vector<1x64x3xbf16> to vector<64x3xbf16>
    %cst_40 = arith.constant dense<0.000000e+00> : vector<64x272xf32>
    %33 = tpu.matmul %32, %30, %cst_40 {dimension_numbers = #tpu.dot_dimension_numbers<[1], [0], [0], [1], [0, 0, 1, 1], [], []>} : vector<64x3xbf16>, vector<3x272xbf16>, vector<64x272xf32> -> vector<64x272xf32>
    %34 = arith.addf %28, %33 : vector<64x272xf32>
    %c0_41 = arith.constant 0 : index
    %c0_42 = arith.constant 0 : index
    %c0_43 = arith.constant 0 : index
    %c17 = arith.constant 17 : index
    %35 = vector.load %arg2[%c0_41, %c0_42, %c0_43, %c17] : memref<1x4x3x290xbf16, #tpu.memory_space<vmem>>, vector<1x1x3x272xbf16>
    %36 = vector.shape_cast %35 : vector<1x1x3x272xbf16> to vector<3x272xbf16>
    %c6 = arith.constant 6 : index
    %c0_44 = arith.constant 0 : index
    %c0_45 = arith.constant 0 : index
    %37 = vector.load %arg3[%c6, %c0_44, %c0_45] : memref<9x64x3xbf16, #tpu.memory_space<vmem>>, vector<1x64x3xbf16>
    %38 = vector.shape_cast %37 : vector<1x64x3xbf16> to vector<64x3xbf16>
    %cst_46 = arith.constant dense<0.000000e+00> : vector<64x272xf32>
    %39 = tpu.matmul %38, %36, %cst_46 {dimension_numbers = #tpu.dot_dimension_numbers<[1], [0], [0], [1], [0, 0, 1, 1], [], []>} : vector<64x3xbf16>, vector<3x272xbf16>, vector<64x272xf32> -> vector<64x272xf32>
    %40 = arith.addf %34, %39 : vector<64x272xf32>
    %c0_47 = arith.constant 0 : index
    %c1_48 = arith.constant 1 : index
    %c0_49 = arith.constant 0 : index
    %c17_50 = arith.constant 17 : index
    %41 = vector.load %arg2[%c0_47, %c1_48, %c0_49, %c17_50] : memref<1x4x3x290xbf16, #tpu.memory_space<vmem>>, vector<1x1x3x272xbf16>
    %42 = vector.shape_cast %41 : vector<1x1x3x272xbf16> to vector<3x272xbf16>
    %c7 = arith.constant 7 : index
    %c0_51 = arith.constant 0 : index
    %c0_52 = arith.constant 0 : index
    %43 = vector.load %arg3[%c7, %c0_51, %c0_52] : memref<9x64x3xbf16, #tpu.memory_space<vmem>>, vector<1x64x3xbf16>
    %44 = vector.shape_cast %43 : vector<1x64x3xbf16> to vector<64x3xbf16>
    %cst_53 = arith.constant dense<0.000000e+00> : vector<64x272xf32>
    %45 = tpu.matmul %44, %42, %cst_53 {dimension_numbers = #tpu.dot_dimension_numbers<[1], [0], [0], [1], [0, 0, 1, 1], [], []>} : vector<64x3xbf16>, vector<3x272xbf16>, vector<64x272xf32> -> vector<64x272xf32>
    %46 = arith.addf %40, %45 : vector<64x272xf32>
    %c0_54 = arith.constant 0 : index
    %c0_55 = arith.constant 0 : index
    %c0_56 = arith.constant 0 : index
    %c18 = arith.constant 18 : index
    %47 = vector.load %arg2[%c0_54, %c0_55, %c0_56, %c18] : memref<1x4x3x290xbf16, #tpu.memory_space<vmem>>, vector<1x1x3x272xbf16>
    %48 = vector.shape_cast %47 : vector<1x1x3x272xbf16> to vector<3x272xbf16>
    %c8 = arith.constant 8 : index
    %c0_57 = arith.constant 0 : index
    %c0_58 = arith.constant 0 : index
    %49 = vector.load %arg3[%c8, %c0_57, %c0_58] : memref<9x64x3xbf16, #tpu.memory_space<vmem>>, vector<1x64x3xbf16>
    %50 = vector.shape_cast %49 : vector<1x64x3xbf16> to vector<64x3xbf16>
    %cst_59 = arith.constant dense<0.000000e+00> : vector<64x272xf32>
    %51 = tpu.matmul %50, %48, %cst_59 {dimension_numbers = #tpu.dot_dimension_numbers<[1], [0], [0], [1], [0, 0, 1, 1], [], []>} : vector<64x3xbf16>, vector<3x272xbf16>, vector<64x272xf32> -> vector<64x272xf32>
    %52 = arith.addf %46, %51 : vector<64x272xf32>
    %c0_60 = arith.constant 0 : index
    %c0_61 = arith.constant 0 : index
    %53 = vector.load %arg4[%c0_60, %c0_61] : memref<64x1xf32, #tpu.memory_space<vmem>>, vector<64x1xf32>
    %54 = vector.broadcast %53 : vector<64x1xf32> to vector<64x272xf32>
    %55 = arith.addf %52, %54 : vector<64x272xf32>
    %cst_62 = arith.constant 0.000000e+00 : f32
    %56 = vector.broadcast %cst_62 : f32 to vector<64x272xf32>
    %57 = arith.maximumf %55, %56 : vector<64x272xf32>
    %c0_63 = arith.constant 0 : index
    %c0_64 = arith.constant 0 : index
    %c0_65 = arith.constant 0 : index
    %58 = vector.load %arg5[%c0_63, %c0_64, %c0_65] : memref<1x64x272xf32, #tpu.memory_space<vmem>>, vector<1x64x272xf32>
    %59 = vector.shape_cast %58 : vector<1x64x272xf32> to vector<64x272xf32>
    %60 = vector.shape_cast %57 : vector<64x272xf32> to vector<1x64x272xf32>
    tpu.vector_store %arg5[%c0_63, %c0_64, %c0_65], %60 {strides = array<i32>} : memref<1x64x272xf32, #tpu.memory_space<vmem>>, vector<1x64x272xf32>,
    return
  }
  func.func @transform_0(%arg0: i32, %arg1: i32) -> (i32, i32, i32, i32) {
    %c0_i32 = arith.constant 0 : i32
    %c0_i32_0 = arith.constant 0 : i32
    %c0_i32_1 = arith.constant 0 : i32
    %c0_i32_2 = arith.constant 0 : i32
    return %arg0, %c0_i32, %c0_i32_0, %c0_i32_1 : i32, i32, i32, i32
  }
  func.func @transform_1(%arg0: i32, %arg1: i32) -> (i32, i32, i32) {
    %c0_i32 = arith.constant 0 : i32
    %c0_i32_0 = arith.constant 0 : i32
    %c0_i32_1 = arith.constant 0 : i32
    return %c0_i32, %arg1, %c0_i32_0 : i32, i32, i32
  }
  func.func @transform_2(%arg0: i32, %arg1: i32) -> (i32, i32) {
    %c0_i32 = arith.constant 0 : i32
    %c0_i32_0 = arith.constant 0 : i32
    return %arg1, %c0_i32 : i32, i32
  }
  func.func @transform_3(%arg0: i32, %arg1: i32) -> (i32, i32, i32) {
    %c0_i32 = arith.constant 0 : i32
    %c0_i32_0 = arith.constant 0 : i32
    return %arg0, %arg1, %c0_i32 : i32, i32, i32
  }
}

</mosaic_0001>

<bundles_post_ra>
// kernel: tpu_custom_call.1
= control target key start
LH: loop header
LB: loop body
LE: loop exit
PB: predicated region body
PF: predicated region fallthrough
CT: control target
= control target key end

     0   :  { %8 = vsyncpa [#allocation3], 0  ;;  %s3487_s0 = inlined_call_operand.vmem [shape: bf16[2,4,3,290], index: 0, kind: input, shape index: {}]   ;;  %s3488_s1 = inlined_call_operand.vmem [shape: bf16[9,64,3], index: 1, kind: input, shape index: {}]   ;;  %s3489_s2 = inlined_call_operand.vmem [shape: f32[64,1], index: 2, kind: input, shape index: {}]   ;;  %s3490_s3 = inlined_call_operand.hbm [shape: f32[2,64,272], index: 3, kind: output, shape index: {}]  }
   0x1   :  { %10 = vsyncpa [#allocation3 + $0x1], 0  ;;  %s2526_s12 = smov 0   ;;  %s2528_s13 = smov 0  }
   0x2   :  { %s2530_s14 = smov 0   ;;  %s2532_s15 = smov 0  }
   0x3   :  { %s2534_s16 = smov 0   ;;  %s2536_s17 = smov 0  }
   0x4 LB: > { %s1980_s18 = sadd.s32 4294967295, %s2497_s17   ;;  %s1981_s19 = sadd.s32 4294967294, %s2497_s17   ;;  %s2497_s17 = sphi %s2536_s17, %s16_s17   ;;  %s2493_s16 = sphi %s2534_s16, %s3497_s16   ;;  %s2489_s15 = sphi %s2532_s15, %s3496_s15   ;;  %s2485_s14 = sphi %s2530_s14, %s3495_s14   ;;  %s2481_s13 = sphi %s2528_s13, %s3494_s13   ;;  %s2477_s12 = sphi %s2526_s12, %s3493_s12  }
   0x5   : > { %s28_s20 = sadd.s32 1, %s2493_s16  ;;  %s115_s21 = sadd.s32 1, %s2485_s14 }
   0x6   : > { %p30_p0 = scmp.ge.s32.totalorder %s28_s20, 2  ;;  %p125_p1 = scmp.ne.s32.totalorder %s2485_s14, %s2481_s13 }
   0x7   : > { %p126_p2 = scmp.eq.s32.totalorder %s1980_s18, 1  ;;  %p131_p3 = scmp.ne.s32.totalorder %s2481_s13, %s2477_s12 }
   0x8   : > { %s3499_s20 = smov (%p30_p0, %s28_s20), 0  ;;  %p132_p5 = scmp.eq.s32.totalorder %s1981_s19, 1 }
   0x9   : > { %p2566_p4 = por %p126_p2, %p125_p1  ;;  %s110_s23 = ssub.s32 %s2493_s16, %s3499_s20 }
   0xa   : > { %p1986_p6 = scmp.ge.s32.totalorder %s2497_s17, 1  ;;  %p113_p7 = scmp.eq.s32.totalorder %s110_s23, 0 }
   0xb   : > { %p2573_p8 = por %p132_p5, %p131_p3  ;;  %p176_p9 = scmp.lt.s32.totalorder %s2497_s17, 3 }
   0xc   : > { %s2579_s25 = scalar_select %p113_p7, %s2485_s14, %s115_s21  }
   0xd   : > { %p177_p10 = pnand %p1986_p6, %p176_p9 }
   0xe   : > { %p210_p11 = scmp.lt.s32.totalorder (!%p177_p10), %s2489_s15, 1  ;;  %s2500_s10 = smov (!%p177_p10), 127  }
   0xf   : > { %180 = sbr.rel (%p177_p10) target bundleno = 699 (0x2bb), region = 32  ;;  %s2501_s23 = smov (!%p177_p10), 111  }
  0x10   : > { %s207_s18 = sand.u32 (!%p177_p10), 1, %s2481_s13   ;;  %s2353_s21 = smul.u32 (!%p177_p10), 192, %s2489_s15 }
  0x11   : > { %s2351_s19 = smul.u32 (!%p177_p10), 192, %s207_s18  ;;  %s2439_s8 = scalar_lea.hbm (!%p177_p10), %s3490_s3, 384 }
  0x14   : > { %s211_s26 = scalar_select %p210_p11, %s2489_s15, 1  ;;  %vm287_vm0 = vcmask 1040384   ;;  %vm288_vm1 = vcmask 1041408   ;;  %v2499_v1 = vmov 65535   ;;  %v2316_v10 = vld [vmem:[%s3488_s1 + $0x20] sm:$0xff]  ;;  %v2317_v11 = vld [vmem:[%s3488_s1 + $0x28] sm:$0xff] }
  0x15   : > { %v289_v2 = vsel %vm287_vm0, 4294967295, %v2499_v1  ;;  %vm274_vm2 = vcmask 23552   ;;  %v2318_v18 = vld [vmem:[%s3488_s1 + $0x30] sm:$0xff]  ;;  %v2319_v29 = vld [vmem:[%s3488_s1 + $0x38] sm:$0xff]  ;;  %v2312_v34 = vld [vmem:[%s3488_s1] sm:$0xff]  ;;  %vm558_vm3 = vcmask 1039360  }
  0x16   : > { %s2352_s27 = smul.u32 24, %s211_s26  ;;  %v2589_v3 = vsel %vm288_vm1, %v289_v2, 0  ;;  %v2313_v35 = vld [vmem:[%s3488_s1 + $0x8] sm:$0xff]  ;;  %v2314_v36 = vld [vmem:[%s3488_s1 + $0x10] sm:$0xff]  ;;  %v2315_v37 = vld [vmem:[%s3488_s1 + $0x18] sm:$0xff]  ;;  %vm1245_vm4 = vcmask 908288  }
  0x17   : > { %v2669_v41 = vld [vmem:[%s3488_s1 + $0x60] sm:$0xff]  ;;  %v2688_v51 = vld [vmem:[%s3488_s1 + $0x68] sm:$0xff]  ;;  %vm1602_vm5 = vcmask 900096   ;;  %vm1835_vm6 = vcmask 130048   ;;  %s1859_s15 = scalar_lea.sflag [#allocation3], %s207_s18 }
  0x18   : > { %s2586_s30 = scalar_lea.vmem %s3487_s0, %s2352_s27  ;;  %v2320_v49 = vld [vmem:[%s3488_s1 + $0x40] sm:$0xff]  ;;  %v2321_v62 = vld [vmem:[%s3488_s1 + $0x48] sm:$0xff]  ;;  %s1873_s27 = scalar_lea.hbm %s3490_s3, %s2353_s21 }
  0x19   : > { %v1988_v0 = vld [vmem:[%s2586_s30 + $0x6] sm:$0x3f]  ;;  %v229_v4 = vld [vmem:[%s2586_s30] sm:$0x3f]  ;;  %v2089_v17 = vld [vmem:[%s2586_s30 + $0xc] sm:$0x3f] }
  0x1a   : > { %270 = vst [vmem:[#allocation1] ss:$4 sm:$0xff] %v1988_v0  ;;  %v514_v13 = vld [vmem:[%s2586_s30] sm:$0x3f]  ;;  %v2126_v25 = vld [vmem:[%s2586_s30 + $0x12] sm:$0x3f] }
  0x1b   : > { %v2163_v30 = vld [vmem:[%s2586_s30 + $0xc] sm:$0x3f]  ;;  %v1201_v42 = vld [vmem:[%s2586_s30] sm:$0x3f]  ;;  %s1876_s29 = sshll.u32 %s1873_s27, 4  ;;  %s1877_s29 = int_to_ptr.hbm [resolvable:$true] %s1876_s29 }
  0x1c   : > { %v2715_v0 = vld [vmem:[%s3488_s1 + $0x70] sm:$0xff]  ;;  %s2433_s4 = sshra.s32 %s1877_s29, 4  ;;  %s2434_s4 = int_to_ptr.hbm [resolvable:$true] %s2433_s4 }
  0x1d   : > { %s2435_s5 = scalar_lea.hbm %s2434_s4, 192  ;;  %p2440_p1 = scmp.lt.s32.totalorder %s2434_s4, %s3490_s3 }
  0x1e   : > { %p2436_p12 = scmp.ne.s32.totalorder %s2434_s4, %s2435_s5  ;;  %p2441_p2 = scmp.lt.s32.totalorder %s2439_s8, %s2435_s5 }
  0x20   : > { %p2437_p13 = pnand %p2436_p12, %p2566_p4  ;;  %p2442_p3 = por %p2441_p2, %p2440_p1 }
  0x21   : > { %v271_v5 = vld.sshfl [vmem:[#allocation1] sm:$0xff pattern:$0x73625140]  ;;  %v272_v6 = vld.sshfl [vmem:[#allocation1 + $0x8] sm:$0xff pattern:$0x73625140] }
  0x22   : > { %v273_v7 = vld.sshfl [vmem:[#allocation1 + $0x10] sm:$0xff pattern:$0x73625140]  ;;  %v291_v8 = vand.u32 %v2589_v3, %v271_v5  ;;  %v293_v9 = vand.u32 %v2589_v3, %v272_v6  ;;  %p2438_p0 = pneg %p2437_p13 }
  0x23   : > { %405 = vst [vmem:[#allocation1] ss:$4 sm:$0xff] %v229_v4  ;;  %v295_v12 = vand.u32 %v2589_v3, %v273_v7 }
  0x24   : > { %304 = vmatpush.bf16.msra.mxu0 %v291_v8  ;;  %2348 = vmatpush.bf16.msra.mxu3 %v291_v8  ;;  %p2443_p5 = pnand %p2442_p3, %p2438_p0 }
  0x25   : > { %2349 = vmatpush.bf16.msra.mxu1 %v293_v9  ;;  %2350 = vmatpush.bf16.msra.mxu2 %v295_v12 }
  0x27   : > { %2013 = vmatmul.msk.bf16.vlgmr.msra.gmra.mxu0 %vm274_vm2, %v2316_v10  ;;  %2014 = vmatmul.msk.bf16.vlgmr.msra.gmra.mxu3 %vm274_vm2, %v2317_v11 }
  0x28   : > { %333 = vmatpush.bf16.msrb.mxu0 %v293_v9  ;;  %2018 = vmatmul.msk.bf16.vlgmr.msra.gmra.mxu1 %vm274_vm2, %v2317_v11 }
  0x29   : > { %2022 = vmatmul.msk.bf16.vlgmr.msra.gmra.mxu2 %vm274_vm2, %v2317_v11 }
  0x2a   : > { %v406_v14 = vld.sshfl [vmem:[#allocation1] sm:$0xff pattern:$0x73625140]  ;;  %v407_v15 = vld.sshfl [vmem:[#allocation1 + $0x8] sm:$0xff pattern:$0x73625140] }
  0x2b   : > { %v408_v16 = vld.sshfl [vmem:[#allocation1 + $0x10] sm:$0xff pattern:$0x73625140]  ;;  %v423_v22 = vand.u32 %v407_v15, %v2589_v3  ;;  %v421_v23 = vand.u32 %v406_v14, %v2589_v3 }
  0x2c   : > { %362 = vmatpush.bf16.msra.mxu0 %v295_v12  ;;  %545 = vst [vmem:[#allocation1] ss:$4 sm:$0xff] %v514_v13  ;;  %v425_v24 = vand.u32 %v408_v16, %v2589_v3  ;;  %v2743_v12 = vld [vmem:[%s3488_s1 + $0x78] sm:$0xff] }
  0x2d   : > { %434 = vmatpush.bf16.msrb.mxu3 %v421_v23  ;;  %v2323_v23 = vld [vmem:[%s3488_s1 + $0x58] sm:$0xff] }
  0x2e   : > { %492 = vmatpush.bf16.msrb.mxu1 %v425_v24  ;;  %v2236_v24 = vld [vmem:[%s2586_s30 + $0x6] sm:$0x3f] }
  0x33   : > { %v550_v19 = vld.sshfl [vmem:[#allocation1 + $0x10] sm:$0xff pattern:$0x73625140]  ;;  %v546_v20 = vld.sshfl [vmem:[#allocation1] sm:$0xff pattern:$0x73625140] }
  0x34   : > { %556 = vrot.lane.b32.xlu1 %v550_v19, %s2500_s10  ;;  %552 = vrot.lane.b32.xlu0 %v546_v20, %s2500_s10  ;;  %v548_v21 = vld.sshfl [vmem:[#allocation1 + $0x8] sm:$0xff pattern:$0x73625140] }
  0x35   : > { %725 = vst [vmem:[#allocation1] ss:$4 sm:$0xff] %v2089_v17 }
  0x37   : > { %2017 = vmatmul.msk.bf16.vlgmr.msrb.gmra.mxu0 %vm274_vm2, %v2316_v10  ;;  %2015 = vmatmul.msk.bf16.gmra.mxu3 %vm274_vm2, %v2318_v18 }
  0x38   : > { %2019 = vmatmul.msk.bf16.gmra.mxu1 %vm274_vm2, %v2318_v18  ;;  %463 = vmatpush.bf16.msrb.mxu0 %v423_v22 }
  0x39   : > { %2023 = vmatmul.msk.bf16.gmra.mxu2 %vm274_vm2, %v2318_v18 }
  0x3c   : > { %554 = vrot.lane.b32.xlu0 %v548_v21, %s2500_s10  ;;  %v726_v26 = vld.sshfl [vmem:[#allocation1] sm:$0xff pattern:$0x73625140]  ;;  %v2620_v27 = vld.sshfl [vmem:[#allocation1 + $0x8] sm:$0xff pattern:$0x73625140] }
  0x3d   : > { %v2623_v28 = vld.sshfl [vmem:[#allocation1 + $0x10] sm:$0xff pattern:$0x73625140]  ;;  %v741_v40 = vand.u32 %v726_v26, %v2589_v3  ;;  %v743_v2 = vand.u32 %v2620_v27, %v2589_v3  ;;  %v2772_v26 = vld [vmem:[%s3488_s1 + $0x80] sm:$0xff] }
  0x3e   : > { %890 = vst [vmem:[#allocation1] ss:$4 sm:$0xff] %v2126_v25  ;;  %v745_v14 = vand.u32 %v2623_v28, %v2589_v3 }
  0x3f   : > { %754 = vmatpush.bf16.msra.mxu1 %v741_v40 }
  0x45   : > { %v2629_v31 = vld.sshfl [vmem:[#allocation1] sm:$0xff pattern:$0x73625140]  ;;  %v2631_v32 = vld.sshfl [vmem:[#allocation1 + $0x8] sm:$0xff pattern:$0x73625140] }
  0x46   : > { %v2633_v33 = vld.sshfl [vmem:[#allocation1 + $0x10] sm:$0xff pattern:$0x73625140]  ;;  %v906_v7 = vand.u32 %v2629_v31, %v2589_v3  ;;  %v908_v20 = vand.u32 %v2631_v32, %v2589_v3 }
  0x47   : > { %1054 = vst [vmem:[#allocation1] ss:$4 sm:$0xff] %v2163_v30  ;;  %2021 = vmatmul.msk.bf16.vlgmr.msra.gmra.mxu0 %vm274_vm2, %v2316_v10  ;;  %2016 = vmatmul.msk.bf16.gmra.mxu3 %vm274_vm2, %v2319_v29  ;;  %v2322_v10 = vld [vmem:[%s3488_s1 + $0x50] sm:$0xff] }
  0x48   : > { %2020 = vmatmul.msk.bf16.gmra.mxu1 %vm274_vm2, %v2319_v29 }
  0x49   : > { %2024 = vmatmul.msk.bf16.gmra.mxu2 %vm274_vm2, %v2319_v29 }
  0x4e   : > { %v1055_v38 = vld.sshfl [vmem:[#allocation1] sm:$0xff pattern:$0x73625140]  ;;  %v1059_v39 = vld.sshfl [vmem:[#allocation1 + $0x10] sm:$0xff pattern:$0x73625140] }
  0x4f   : > { %1061 = vrot.lane.b32.xlu1 %v1055_v38, %s2500_s10  ;;  %v1057_v45 = vld.sshfl [vmem:[#allocation1 + $0x8] sm:$0xff pattern:$0x73625140] }
  0x50   : > { %1063 = vrot.lane.b32.xlu2 %v1057_v45, %s2500_s10  ;;  %1232 = vst [vmem:[#allocation1] ss:$4 sm:$0xff] %v1201_v42  ;;  %v2800_v42 = vld [vmem:[%s3488_s1 + $0x88] sm:$0xff] }
  0x57   : > { %2045 = vmatmul.msk.bf16.vlgmr.msrb.gmra.mxu0 %vm274_vm2, %v2312_v34  ;;  %2041 = vmatmul.msk.bf16.vlgmr.msrb.gmra.mxu3 %vm274_vm2, %v2312_v34  ;;  %v1235_v9 = vld.sshfl [vmem:[#allocation1 + $0x8] sm:$0xff pattern:$0x73625140]  ;;  %v1233_v21 = vld.sshfl [vmem:[#allocation1] sm:$0xff pattern:$0x73625140] }
  0x58   : > { %2049 = vmatmul.msk.bf16.vlgmr.msrb.gmra.mxu1 %vm274_vm2, %v2312_v34  ;;  %1065 = vrot.lane.b32.xlu1 %v1059_v39, %s2500_s10  ;;  %v1237_v28 = vld.sshfl [vmem:[#allocation1 + $0x10] sm:$0xff pattern:$0x73625140] }
  0x59   : > { %1241 = vrot.lane.b32.xlu0 %v1235_v9, %s2501_s23  ;;  %1239 = vrot.lane.b32.xlu2 %v1233_v21, %s2501_s23  ;;  %1411 = vst [vmem:[#allocation1] ss:$4 sm:$0xff] %v2236_v24  ;;  %v1558_v21 = vld [vmem:[%s2586_s30] sm:$0x3f]  ;;  %s2502_s30 = smov 110  }
  0x5a   : > { %948 = vmatpush.bf16.msrb.mxu1 %v908_v20 }
  0x60   : > { %v1414_v34 = vld.sshfl [vmem:[#allocation1 + $0x8] sm:$0xff pattern:$0x73625140] }
  0x61   : > { %1243 = vrot.lane.b32.xlu2 %v1237_v28, %s2501_s23  ;;  %1420 = vrot.lane.b32.xlu0 %v1414_v34, %s2501_s23  ;;  %v2865_v28 = vld [vmem:[%s3488_s1 + $0x98] sm:$0xff] }
  0x67   : > { %2046 = vmatmul.msk.bf16.gmra.mxu0 %vm274_vm2, %v2313_v35  ;;  %2042 = vmatmul.msk.bf16.gmra.mxu3 %vm274_vm2, %v2313_v35 }
  0x68   : > { %2050 = vmatmul.msk.bf16.gmra.mxu1 %vm274_vm2, %v2313_v35 }
  0x77   : > { %2047 = vmatmul.msk.bf16.gmra.mxu0 %vm274_vm2, %v2314_v36  ;;  %2043 = vmatmul.msk.bf16.gmra.mxu3 %vm274_vm2, %v2314_v36 }
  0x78   : > { %2051 = vmatmul.msk.bf16.gmra.mxu1 %vm274_vm2, %v2314_v36 }
  0x87   : > { %2048 = vmatmul.msk.bf16.gmra.mxu0 %vm274_vm2, %v2315_v37  ;;  %2044 = vmatmul.msk.bf16.gmra.mxu3 %vm274_vm2, %v2315_v37 }
  0x88   : > { %2052 = vmatmul.msk.bf16.gmra.mxu1 %vm274_vm2, %v2315_v37 }
  0x98   : > { %2114 = vmatmul.msk.bf16.vlgmr.msra.gmra.mxu1 %vm274_vm2, %v2669_v41 }
  0xa4   : > { %v2674_v43 = vpop.f32.mrf.mxu0 }
  0xa5   : > { %v2676_v44 = vpop.f32.mrf.mxu1 }
  0xa6   : > { %v557_v46 = vpop.permute.xlu1 %556  ;;  %v553_v47 = vpop.permute.xlu0 %552 }
  0xa7   : > { %v580_v48 = vand.u32 %v557_v46, %v2589_v3 }
  0xa8   : > { %2115 = vmatmul.msk.bf16.gmra.mxu1 %vm274_vm2, %v2688_v51 }
  0xa9   : > { %647 = vmatpush.bf16.msra.mxu0 %v580_v48 }
  0xaa   : > { %v2683_v50 = vpop.f32.mrf.mxu3 }
  0xac   : > { %2085 = vmatmul.msk.bf16.vlgmr.msra.gmra.mxu0 %vm274_vm2, %v2320_v49  ;;  %v2691_v52 = vpop.f32.mrf.mxu0  ;;  %v369_v31 = vpop.f32.mrf.mxu2 }
  0xad   : > { %v2695_v53 = vpop.f32.mrf.mxu1  ;;  %919 = vmatpush.bf16.msrb.mxu0 %v906_v7  ;;  %v1064_v7 = vpop.permute.xlu2 %1063 }
  0xae   : > { %v555_v54 = vpop.permute.xlu0 %554 }
  0xaf   : > { %v559_v55 = vsel %vm558_vm3, %v553_v47, %v555_v54  ;;  %v560_v56 = vsel %vm558_vm3, %v555_v54, %v557_v46  ;;  %v1412_v54 = vld.sshfl [vmem:[#allocation1] sm:$0xff pattern:$0x73625140] }
  0xb0   : > { %v577_v57 = vand.u32 %v560_v56, %v2589_v3  ;;  %v574_v58 = vand.u32 %v559_v55, %v2589_v3  ;;  %1418 = vrot.lane.b32.xlu2 %v1412_v54, %s2501_s23 }
  0xb2   : > { %589 = vmatpush.bf16.msrb.mxu2 %v574_v58  ;;  %618 = vmatpush.bf16.msra.mxu3 %v577_v57  ;;  %v2701_v59 = vpop.f32.mrf.mxu3  ;;  %v2828_v57 = vld [vmem:[%s3488_s1 + $0x90] sm:$0xff] }
  0xb4   : > { %v335_v60 = vpop.f32.mrf.mxu0  ;;  %v2795_v40 = vpop.f32.mrf.mxu2 }
  0xb5   : > { %2077 = vmatmul.msk.bf16.vlgmr.msrb.gmra.mxu2 %vm274_vm2, %v2320_v49  ;;  %2081 = vmatmul.msk.bf16.vlgmr.msra.gmra.mxu3 %vm274_vm2, %v2320_v49  ;;  %v2705_v61 = vpop.f32.mrf.mxu1 }
  0xb6   : > { %783 = vmatpush.bf16.msra.mxu2 %v743_v2  ;;  %812 = vmatpush.bf16.msrb.mxu3 %v745_v14 }
  0xb8   : > { %2116 = vmatmul.msk.bf16.gmra.mxu1 %vm274_vm2, %v2715_v0 }
  0xba   : > { %v2710_v63 = vpop.f32.mrf.mxu3 }
  0xbc   : > { %2086 = vmatmul.msk.bf16.gmra.mxu0 %vm274_vm2, %v2321_v62  ;;  %v2718_v1 = vpop.f32.mrf.mxu0  ;;  %v374_v48 = vpop.f32.mrf.mxu2 }
  0xbd   : > { %v2724_v4 = vpop.f32.mrf.mxu1 }
  0xc2   : > { %v2726_v5 = vpop.f32.mrf.mxu3 }
  0xc4   : > { %v364_v6 = vpop.f32.mrf.mxu0 }
  0xc5   : > { %2078 = vmatmul.msk.bf16.gmra.mxu2 %vm274_vm2, %v2321_v62  ;;  %2082 = vmatmul.msk.bf16.gmra.mxu3 %vm274_vm2, %v2321_v62  ;;  %v2732_v8 = vpop.f32.mrf.mxu1  ;;  %v2841_v62 = vpop.f32.mrf.mxu2 }
  0xc8   : > { %2117 = vmatmul.msk.bf16.gmra.mxu1 %vm274_vm2, %v2743_v12 }
  0xca   : > { %v2738_v11 = vpop.f32.mrf.mxu3 }
  0xcc   : > { %2087 = vmatmul.msk.bf16.gmra.mxu0 %vm274_vm2, %v2322_v10  ;;  %v2746_v13 = vpop.f32.mrf.mxu0 }
  0xcd   : > { %v2752_v15 = vpop.f32.mrf.mxu1 }
  0xd2   : > { %v2754_v16 = vpop.f32.mrf.mxu3 }
  0xd4   : > { %v465_v17 = vpop.f32.mrf.mxu0 }
  0xd5   : > { %2079 = vmatmul.msk.bf16.gmra.mxu2 %vm274_vm2, %v2322_v10  ;;  %2083 = vmatmul.msk.bf16.gmra.mxu3 %vm274_vm2, %v2322_v10  ;;  %v2758_v18 = vadd.f32 %v465_v17, %v335_v60  ;;  %v494_v19 = vpop.f32.mrf.mxu1  ;;  %v1062_v60 = vpop.permute.xlu1 %1061 }
  0xd6   : > { %v2762_v22 = vadd.f32 %v494_v19, %v364_v6  ;;  %v1067_v10 = vsel %vm558_vm3, %v1062_v60, %v1064_v7  ;;  %v2333_v60 = vld [vmem:[%s3488_s1 + $0xa8] sm:$0xff] }
  0xd7   : > { %v1082_v19 = vand.u32 %v1067_v10, %v2589_v3  ;;  %v1240_v10 = vpop.permute.xlu2 %1239 }
  0xd8   : > { %2155 = vmatmul.msk.bf16.vlgmr.msrb.gmra.mxu1 %vm274_vm2, %v2772_v26 }
  0xd9   : > { %1097 = vmatpush.bf16.msra.mxu3 %v1082_v19 }
  0xda   : > { %v436_v25 = vpop.f32.mrf.mxu3 }
  0xdb   : > { %v2775_v27 = vadd.f32 %v436_v25, %v2674_v43  ;;  %v1416_v25 = vld.sshfl [vmem:[#allocation1 + $0x10] sm:$0xff pattern:$0x73625140] }
  0xdc   : > { %2088 = vmatmul.msk.bf16.gmra.mxu0 %vm274_vm2, %v2323_v23  ;;  %v2778_v29 = vpop.f32.mrf.mxu0  ;;  %1422 = vrot.lane.b32.xlu1 %v1416_v25, %s2501_s23  ;;  %1589 = vst [vmem:[#allocation1] ss:$4 sm:$0xff] %v1558_v21 }
  0xdd   : > { %v2782_v30 = vpop.f32.mrf.mxu1  ;;  %v1066_v9 = vpop.permute.xlu1 %1065 }
  0xde   : > { %v1068_v14 = vsel %vm558_vm3, %v1064_v7, %v1066_v9  ;;  %v1088_v17 = vand.u32 %v1066_v9, %v2589_v3 }
  0xdf   : > { %v1085_v20 = vand.u32 %v1068_v14, %v2589_v3 }
  0xe0   : > { %1155 = vmatpush.bf16.msra.mxu1 %v1088_v17 }
  0xe1   : > { %1126 = vmatpush.bf16.msra.mxu0 %v1085_v20 }
  0xe2   : > { %v2785_v32 = vpop.f32.mrf.mxu3 }
  0xe4   : > { %v470_v35 = vpop.f32.mrf.mxu0 }
  0xe5   : > { %2080 = vmatmul.msk.bf16.gmra.mxu2 %vm274_vm2, %v2323_v23  ;;  %2084 = vmatmul.msk.bf16.gmra.mxu3 %vm274_vm2, %v2323_v23  ;;  %v2791_v36 = vadd.f32 %v470_v35, %v2676_v44  ;;  %v499_v37 = vpop.f32.mrf.mxu1  ;;  %v379_v23 = vpop.f32.mrf.mxu2  ;;  %v1590_v35 = vld.sshfl [vmem:[#allocation1] sm:$0xff pattern:$0x73625140] }
  0xe6   : > { %v2793_v38 = vadd.f32 %v499_v37, %v369_v31  ;;  %1596 = vrot.lane.b32.xlu1 %v1590_v35, %s2502_s30  ;;  %v2332_v37 = vld [vmem:[%s3488_s1 + $0xa0] sm:$0xff]  ;;  %v439_v35 = vadd.f32 %v2785_v32, %v2691_v52 }
  0xe8   : > { %2156 = vmatmul.msk.bf16.gmra.mxu1 %vm274_vm2, %v2800_v42 }
  0xea   : > { %v441_v39 = vpop.f32.mrf.mxu3 }
  0xeb   : > { %v2803_v43 = vadd.f32 %v441_v39, %v2683_v50 }
  0xec   : > { %2151 = vmatmul.msk.bf16.vlgmr.msrb.gmra.mxu0 %vm274_vm2, %v2772_v26  ;;  %v2807_v45 = vpop.f32.mrf.mxu0 }
  0xed   : > { %v2811_v44 = vpop.f32.mrf.mxu1 }
  0xf2   : > { %v2813_v46 = vpop.f32.mrf.mxu3 }
  0xf4   : > { %v475_v47 = vpop.f32.mrf.mxu0 }
  0xf5   : > { %2118 = vmatmul.msk.bf16.vlgmr.msra.gmra.mxu2 %vm274_vm2, %v2669_v41  ;;  %2122 = vmatmul.msk.bf16.vlgmr.msrb.gmra.mxu3 %vm274_vm2, %v2669_v41  ;;  %v2820_v49 = vadd.f32 %v475_v47, %v2705_v61  ;;  %v504_v50 = vpop.f32.mrf.mxu1  ;;  %v910_v61 = vand.u32 %v2633_v33, %v2589_v3 }
  0xf6   : > { %v2822_v55 = vadd.f32 %v504_v50, %v374_v48  ;;  %v1594_v48 = vld.sshfl [vmem:[#allocation1 + $0x10] sm:$0xff pattern:$0x73625140] }
  0xf7   : > { %977 = vmatpush.bf16.msrb.mxu2 %v910_v61  ;;  %1600 = vrot.lane.b32.xlu0 %v1594_v48, %s2502_s30  ;;  %v497_v61 = vadd.f32 %v2782_v30, %v2746_v13 }
  0xf8   : > { %2157 = vmatmul.msk.bf16.gmra.mxu1 %vm274_vm2, %v2828_v57 }
  0xfa   : > { %v446_v56 = vpop.f32.mrf.mxu3 }
  0xfb   : > { %v2831_v58 = vadd.f32 %v446_v56, %v2710_v63  ;;  %v1592_v56 = vld.sshfl [vmem:[#allocation1 + $0x8] sm:$0xff pattern:$0x73625140] }
  0xfc   : > { %2152 = vmatmul.msk.bf16.gmra.mxu0 %vm274_vm2, %v2800_v42  ;;  %v2835_v41 = vpop.f32.mrf.mxu0  ;;  %1598 = vrot.lane.b32.xlu2 %v1592_v56, %s2502_s30  ;;  %s3337_s30 = scalar_lea.vmem [#allocation2], %s2351_s19 }
  0xfd   : > { %v2843_v2 = vpop.f32.mrf.mxu1  ;;  %s1874_s28 = sshll.u32 %s3337_s30, 4  ;;  %s1875_s28 = int_to_ptr.vmem [resolvable:$true] %s1874_s28 }
 0x102   : > { %v2845_v63 = vpop.f32.mrf.mxu3 }
 0x104   : > { %v480_v6 = vpop.f32.mrf.mxu0 }
 0x105   : > { %2119 = vmatmul.msk.bf16.gmra.mxu2 %vm274_vm2, %v2688_v51  ;;  %2123 = vmatmul.msk.bf16.gmra.mxu3 %vm274_vm2, %v2688_v51  ;;  %v2852_v33 = vadd.f32 %v480_v6, %v2732_v8  ;;  %v509_v24 = vpop.f32.mrf.mxu1  ;;  %v2903_v6 = vpop.f32.mrf.mxu2 }
 0x106   : > { %v2860_v51 = vadd.f32 %v509_v24, %v379_v23  ;;  %v1242_v24 = vpop.permute.xlu0 %1241 }
 0x108   : > { %2158 = vmatmul.msk.bf16.gmra.mxu1 %vm274_vm2, %v2865_v28 }
 0x10a   : > { %v451_v8 = vpop.f32.mrf.mxu3 }
 0x10b   : > { %v2868_v31 = vadd.f32 %v451_v8, %v2738_v11 }
 0x10c   : > { %2153 = vmatmul.msk.bf16.gmra.mxu0 %vm274_vm2, %v2828_v57  ;;  %v2887_v39 = vpop.f32.mrf.mxu0 }
 0x10d   : > { %v2875_v34 = vpop.f32.mrf.mxu1 }
 0x115   : > { %2120 = vmatmul.msk.bf16.gmra.mxu2 %vm274_vm2, %v2715_v0  ;;  %2124 = vmatmul.msk.bf16.gmra.mxu3 %vm274_vm2, %v2715_v0  ;;  %v756_v11 = vpop.f32.mrf.mxu1 }
 0x118   : > { %2196 = vmatmul.msk.bf16.vlgmr.msra.gmra.mxu1 %vm274_vm2, %v2332_v37 }
 0x11c   : > { %2154 = vmatmul.msk.bf16.gmra.mxu0 %vm274_vm2, %v2865_v28 }
 0x11d   : > { %v758_v47 = vpop.f32.mrf.mxu1 }
 0x125   : > { %2121 = vmatmul.msk.bf16.gmra.mxu2 %vm274_vm2, %v2743_v12  ;;  %2125 = vmatmul.msk.bf16.gmra.mxu3 %vm274_vm2, %v2743_v12  ;;  %v761_v54 = vpop.f32.mrf.mxu1  ;;  %v2905_v12 = vpop.f32.mrf.mxu3 }
 0x128   : > { %2197 = vmatmul.msk.bf16.gmra.mxu1 %vm274_vm2, %v2333_v60 }
 0x129   : > { %v649_v0 = vpop.f32.mrf.mxu0 }
 0x12a   : > { %v2894_v50 = vadd.f32 %v649_v0, %v2762_v22 }
 0x12c   : > { %2192 = vmatmul.msk.bf16.vlgmr.msra.gmra.mxu0 %vm274_vm2, %v2332_v37 }
 0x12d   : > { %v763_v9 = vpop.f32.mrf.mxu1 }
 0x131   : > { %v651_v22 = vpop.f32.mrf.mxu0 }
 0x132   : > { %v2907_v7 = vadd.f32 %v651_v22, %v497_v61 }
 0x135   : > { %2159 = vmatmul.msk.bf16.vlgmr.msrb.gmra.mxu2 %vm274_vm2, %v2772_v26  ;;  %2188 = vmatmul.msk.bf16.vlgmr.msra.gmra.mxu3 %vm274_vm2, %v2332_v37  ;;  %v2919_v21 = vpop.f32.mrf.mxu1  ;;  %v2334_v26 = vld [vmem:[%s3488_s1 + $0xb0] sm:$0xff]  ;;  %v502_v37 = vadd.f32 %v2811_v44, %v2795_v40 }
 0x138   : > { %v591_v14 = vpop.f32.mrf.mxu2  ;;  %v620_v17 = vpop.f32.mrf.mxu3  ;;  %2198 = vmatmul.msk.bf16.gmra.mxu1 %vm274_vm2, %v2334_v26 }
 0x139   : > { %v669_v19 = vadd.f32 %v591_v14, %v2775_v27  ;;  %v2914_v13 = vadd.f32 %v620_v17, %v2758_v18  ;;  %v654_v30 = vpop.f32.mrf.mxu0  ;;  %v1246_v18 = vsel %vm1245_vm4, %v1240_v10, %v1242_v24  ;;  %v1244_v27 = vpop.permute.xlu2 %1243 }
 0x13a   : > { %v2917_v20 = vadd.f32 %v654_v30, %v2793_v38  ;;  %v1261_v38 = vand.u32 %v1246_v18, %v2589_v3  ;;  %v1247_v8 = vsel %vm1245_vm4, %v1242_v24, %v1244_v27  ;;  %v1267_v25 = vand.u32 %v1244_v27, %v2589_v3 }
 0x13b   : > { %v2921_v23 = vadd.f32 %v756_v11, %v669_v19  ;;  %v1264_v11 = vand.u32 %v1247_v8, %v2589_v3 }
 0x13c   : > { %2193 = vmatmul.msk.bf16.gmra.mxu0 %vm274_vm2, %v2333_v60  ;;  %1276 = vmatpush.bf16.msra.mxu2 %v1261_v38 }
 0x13d   : > { %1334 = vmatpush.bf16.msrb.mxu0 %v1267_v25  ;;  %1305 = vmatpush.bf16.msrb.mxu3 %v1264_v11  ;;  %v768_v10 = vpop.f32.mrf.mxu1 }
 0x140   : > { %v593_v48 = vpop.f32.mrf.mxu2  ;;  %v2937_v0 = vpop.f32.mrf.mxu3 }
 0x141   : > { %v672_v56 = vadd.f32 %v593_v48, %v439_v35  ;;  %v656_v61 = vpop.f32.mrf.mxu0  ;;  %v2993_v48 = vld [vmem:[%s3488_s1 + $0xe0] sm:$0xff] }
 0x142   : > { %v2939_v22 = vadd.f32 %v656_v61, %v502_v37 }
 0x143   : > { %v2941_v14 = vadd.f32 %v758_v47, %v672_v56 }
 0x145   : > { %2160 = vmatmul.msk.bf16.gmra.mxu2 %vm274_vm2, %v2800_v42  ;;  %2189 = vmatmul.msk.bf16.gmra.mxu3 %vm274_vm2, %v2333_v60  ;;  %v771_v30 = vpop.f32.mrf.mxu1  ;;  %v2335_v42 = vld [vmem:[%s3488_s1 + $0xb8] sm:$0xff] }
 0x148   : > { %v596_v52 = vpop.f32.mrf.mxu2  ;;  %v625_v32 = vpop.f32.mrf.mxu3  ;;  %2199 = vmatmul.msk.bf16.gmra.mxu1 %vm274_vm2, %v2335_v42 }
 0x149   : > { %v675_v40 = vadd.f32 %v596_v52, %v2803_v43  ;;  %v2948_v44 = vadd.f32 %v625_v32, %v2791_v36  ;;  %v659_v17 = vpop.f32.mrf.mxu0  ;;  %v473_v43 = vadd.f32 %v2807_v45, %v2695_v53  ;;  %v444_v36 = vadd.f32 %v2813_v46, %v2701_v59  ;;  %v1419_v53 = vpop.permute.xlu2 %1418 }
 0x14a   : > { %v2951_v19 = vadd.f32 %v659_v17, %v2822_v55  ;;  %v507_v55 = vadd.f32 %v2843_v2, %v2841_v62  ;;  %v2975_v59 = vpop.permute.xlu0 %1420 }
 0x14b   : > { %v2953_v24 = vadd.f32 %v761_v54, %v675_v40  ;;  %v1424_v45 = vsel %vm1245_vm4, %v1419_v53, %v2975_v59 }
 0x14c   : > { %2194 = vmatmul.msk.bf16.gmra.mxu0 %vm274_vm2, %v2334_v26  ;;  %v1439_v2 = vand.u32 %v1424_v45, %v2589_v3 }
 0x14d   : > { %v773_v8 = vpop.f32.mrf.mxu1 }
 0x14e   : > { %1454 = vmatpush.bf16.msrb.mxu1 %v1439_v2  ;;  %v3063_v2 = vld [vmem:[%s3488_s1 + $0xf0] sm:$0xff] }
 0x150   : > { %v598_v47 = vpop.f32.mrf.mxu2  ;;  %v627_v54 = vpop.f32.mrf.mxu3 }
 0x151   : > { %v678_v60 = vadd.f32 %v598_v47, %v444_v36  ;;  %v2966_v18 = vadd.f32 %v627_v54, %v473_v43  ;;  %v661_v27 = vpop.f32.mrf.mxu0 }
 0x152   : > { %v2968_v38 = vadd.f32 %v661_v27, %v507_v55 }
 0x153   : > { %v2970_v25 = vadd.f32 %v763_v9, %v678_v60 }
 0x155   : > { %2161 = vmatmul.msk.bf16.gmra.mxu2 %vm274_vm2, %v2828_v57  ;;  %2190 = vmatmul.msk.bf16.gmra.mxu3 %vm274_vm2, %v2334_v26  ;;  %v950_v26 = vpop.f32.mrf.mxu1 }
 0x158   : > { %v601_v46 = vpop.f32.mrf.mxu2  ;;  %v630_v62 = vpop.f32.mrf.mxu3  ;;  %2261 = vmatmul.msk.bf16.vlgmr.msrb.gmra.mxu1 %vm274_vm2, %v2993_v48 }
 0x159   : > { %v681_v35 = vadd.f32 %v601_v46, %v2831_v58  ;;  %v2982_v9 = vadd.f32 %v630_v62, %v2820_v49  ;;  %v664_v11 = vpop.f32.mrf.mxu0  ;;  %v478_v49 = vadd.f32 %v2835_v41, %v2724_v4  ;;  %v449_v58 = vadd.f32 %v2845_v63, %v2726_v5  ;;  %v2336_v41 = vld [vmem:[%s3488_s1 + $0xc0] sm:$0xff] }
 0x15a   : > { %v2985_v57 = vadd.f32 %v664_v11, %v2860_v51  ;;  %v512_v51 = vadd.f32 %v2875_v34, %v2903_v6 }
 0x15b   : > { %v2988_v37 = vadd.f32 %v2919_v21, %v681_v35 }
 0x15c   : > { %2195 = vmatmul.msk.bf16.gmra.mxu0 %vm274_vm2, %v2335_v42 }
 0x15d   : > { %v952_v17 = vpop.f32.mrf.mxu1 }
 0x160   : > { %v603_v21 = vpop.f32.mrf.mxu2  ;;  %v632_v56 = vpop.f32.mrf.mxu3 }
 0x161   : > { %v684_v61 = vadd.f32 %v603_v21, %v449_v58  ;;  %v3004_v52 = vadd.f32 %v632_v56, %v478_v49  ;;  %v666_v32 = vpop.f32.mrf.mxu0 }
 0x162   : > { %v3006_v40 = vadd.f32 %v666_v32, %v512_v51 }
 0x163   : > { %v3008_v43 = vadd.f32 %v768_v10, %v684_v61 }
 0x165   : > { %2162 = vmatmul.msk.bf16.gmra.mxu2 %vm274_vm2, %v2865_v28  ;;  %2191 = vmatmul.msk.bf16.gmra.mxu3 %vm274_vm2, %v2335_v42  ;;  %v955_v36 = vpop.f32.mrf.mxu1  ;;  %v3028_v28 = vld [vmem:[%s3488_s1 + $0xe8] sm:$0xff] }
 0x168   : > { %v606_v4 = vpop.f32.mrf.mxu2  ;;  %v635_v5 = vpop.f32.mrf.mxu3  ;;  %2262 = vmatmul.msk.bf16.gmra.mxu1 %vm274_vm2, %v3028_v28 }
 0x169   : > { %v687_v63 = vadd.f32 %v606_v4, %v2868_v31  ;;  %v3018_v34 = vadd.f32 %v635_v5, %v2852_v33  ;;  %v921_v6 = vpop.f32.mrf.mxu0  ;;  %v483_v33 = vadd.f32 %v2887_v39, %v2752_v15  ;;  %v454_v31 = vadd.f32 %v2905_v12, %v2754_v16  ;;  %v2337_v16 = vld [vmem:[%s3488_s1 + $0xc8] sm:$0xff] }
 0x16a   : > { %v3021_v10 = vadd.f32 %v921_v6, %v2921_v23 }
 0x16b   : > { %v3023_v55 = vadd.f32 %v771_v30, %v687_v63 }
 0x16c   : > { %2232 = vmatmul.msk.bf16.vlgmr.msrb.gmra.mxu0 %vm274_vm2, %v2336_v41 }
 0x16d   : > { %v957_v27 = vpop.f32.mrf.mxu1 }
 0x170   : > { %v608_v23 = vpop.f32.mrf.mxu2  ;;  %v637_v42 = vpop.f32.mrf.mxu3 }
 0x171   : > { %v690_v30 = vadd.f32 %v608_v23, %v454_v31  ;;  %v3037_v47 = vadd.f32 %v637_v42, %v483_v33  ;;  %v923_v54 = vpop.f32.mrf.mxu0  ;;  %v3104_v23 = vld [vmem:[%s3488_s1 + $0xf8] sm:$0xff] }
 0x172   : > { %v3040_v60 = vadd.f32 %v923_v54, %v2941_v14 }
 0x173   : > { %v3042_v53 = vadd.f32 %v773_v8, %v690_v30 }
 0x175   : > { %2224 = vmatmul.msk.bf16.vlgmr.msra.gmra.mxu2 %vm274_vm2, %v2336_v41  ;;  %2228 = vmatmul.msk.bf16.vlgmr.msrb.gmra.mxu3 %vm274_vm2, %v2336_v41  ;;  %v3056_v8 = vpop.f32.mrf.mxu1 }
 0x178   : > { %v785_v15 = vpop.f32.mrf.mxu2  ;;  %v814_v39 = vpop.f32.mrf.mxu3  ;;  %2263 = vmatmul.msk.bf16.gmra.mxu1 %vm274_vm2, %v3063_v2 }
 0x179   : > { %v835_v12 = vadd.f32 %v785_v15, %v2914_v13  ;;  %v3051_v45 = vadd.f32 %v814_v39, %v2894_v50  ;;  %v926_v14 = vpop.f32.mrf.mxu0  ;;  %v468_v13 = vadd.f32 %v2778_v29, %v2718_v1  ;;  %v1423_v50 = vpop.permute.xlu1 %1422 }
 0x17a   : > { %v3054_v46 = vadd.f32 %v926_v14, %v2953_v24  ;;  %v1425_v24 = vsel %vm1245_vm4, %v2975_v59, %v1423_v50  ;;  %v1445_v35 = vand.u32 %v1423_v50, %v2589_v3  ;;  %v1601_v39 = vpop.permute.xlu0 %1600 }
 0x17b   : > { %v3058_v62 = vadd.f32 %v950_v26, %v835_v12  ;;  %v673_v11 = vadd.f32 %v2937_v0, %v468_v13  ;;  %v1442_v26 = vand.u32 %v1425_v24, %v2589_v3  ;;  %v1599_v0 = vpop.permute.xlu2 %1598  ;;  %v1737_v13 = vld [vmem:[%s3489_s2] sm:$0xff] }
 0x17c   : > { %2233 = vmatmul.msk.bf16.gmra.mxu0 %vm274_vm2, %v2337_v16  ;;  %1512 = vmatpush.bf16.msra.mxu3 %v1445_v35 }
 0x17d   : > { %1483 = vmatpush.bf16.msrb.mxu2 %v1442_v26  ;;  %v3081_v56 = vpop.f32.mrf.mxu1 }
 0x180   : > { %v787_v49 = vpop.f32.mrf.mxu2  ;;  %v816_v58 = vpop.f32.mrf.mxu3 }
 0x181   : > { %v838_v51 = vadd.f32 %v787_v49, %v673_v11  ;;  %v3076_v21 = vadd.f32 %v816_v58, %v2907_v7  ;;  %v928_v1 = vpop.f32.mrf.mxu0  ;;  %v1597_v61 = vpop.permute.xlu1 %1596 }
 0x182   : > { %v3079_v29 = vadd.f32 %v928_v1, %v2970_v25  ;;  %v1603_v32 = vsel %vm1602_vm5, %v1597_v61, %v1599_v0  ;;  %v2338_v25 = vld [vmem:[%s3488_s1 + $0xd0] sm:$0xff] }
 0x183   : > { %v3083_v59 = vadd.f32 %v952_v17, %v838_v51  ;;  %v1618_v7 = vand.u32 %v1603_v32, %v2589_v3 }
 0x185   : > { %2225 = vmatmul.msk.bf16.gmra.mxu2 %vm274_vm2, %v2337_v16  ;;  %2229 = vmatmul.msk.bf16.gmra.mxu3 %vm274_vm2, %v2337_v16  ;;  %v965_v33 = vpop.f32.mrf.mxu1  ;;  %v2503_v16 = vmov 0  }
 0x186   : > { %1633 = vmatpush.bf16.msra.mxu0 %v1618_v7  ;;  %2416 = vset.pattern.permute.xlu0 %v2503_v16 }
 0x187   : > { %2417 = vset.pattern.permute.xlu1 %v2503_v16  ;;  %2418 = vset.pattern.permute.xlu2 %v2503_v16 }
 0x188   : > { %v790_v4 = vpop.f32.mrf.mxu2  ;;  %v819_v5 = vpop.f32.mrf.mxu3  ;;  %2264 = vmatmul.msk.bf16.gmra.mxu1 %vm274_vm2, %v3104_v23  ;;  %1747 = vperm.xlu0 %2416, %v1737_v13  }
 0x189   : > { %v841_v17 = vadd.f32 %v790_v4, %v2948_v44  ;;  %v3094_v41 = vadd.f32 %v819_v5, %v2917_v20  ;;  %v931_v63 = vpop.f32.mrf.mxu0 }
 0x18a   : > { %v3097_v6 = vadd.f32 %v931_v63, %v2988_v37 }
 0x18b   : > { %v3099_v31 = vadd.f32 %v955_v36, %v841_v17 }
 0x18c   : > { %2234 = vmatmul.msk.bf16.gmra.mxu0 %vm274_vm2, %v2338_v25 }
 0x18d   : > { %v967_v54 = vpop.f32.mrf.mxu1 }
 0x190   : > { %v792_v20 = vpop.f32.mrf.mxu2  ;;  %v821_v44 = vpop.f32.mrf.mxu3 }
 0x191   : > { %v844_v42 = vadd.f32 %v792_v20, %v2966_v18  ;;  %v3111_v37 = vadd.f32 %v821_v44, %v2939_v22  ;;  %v933_v30 = vpop.f32.mrf.mxu0  ;;  %v1604_v18 = vsel %vm1602_vm5, %v1599_v0, %v1601_v39  ;;  %v1624_v22 = vand.u32 %v1601_v39, %v2589_v3 }
 0x192   : > { %v3114_v36 = vadd.f32 %v933_v30, %v3008_v43  ;;  %v2339_v43 = vld [vmem:[%s3488_s1 + $0xd8] sm:$0xff] }
 0x193   : > { %v3116_v15 = vadd.f32 %v957_v27, %v844_v42  ;;  %v1621_v27 = vand.u32 %v1604_v18, %v2589_v3  ;;  %1691 = vmatpush.bf16.msra.mxu2 %v1624_v22  ;;  %v3142_v3 = vld [vmem:[%s3488_s1 + $0x100] sm:$0xff] }
 0x195   : > { %2226 = vmatmul.msk.bf16.gmra.mxu2 %vm274_vm2, %v2338_v25  ;;  %2230 = vmatmul.msk.bf16.gmra.mxu3 %vm274_vm2, %v2338_v25  ;;  %v1157_v26 = vpop.f32.mrf.mxu1 }
 0x196   : > { %1662 = vmatpush.bf16.msra.mxu1 %v1621_v27 }
 0x198   : > { %v795_v12 = vpop.f32.mrf.mxu2  ;;  %v824_v14 = vpop.f32.mrf.mxu3 }
 0x199   : > { %v847_v50 = vadd.f32 %v795_v12, %v2982_v9  ;;  %v3131_v24 = vadd.f32 %v824_v14, %v2951_v19  ;;  %v936_v35 = vpop.f32.mrf.mxu0  ;;  %2301 = vmatmul.msk.bf16.vlgmr.msra.gmra.mxu1 %vm274_vm2, %v3142_v3 }
 0x19a   : > { %v3134_v11 = vadd.f32 %v936_v35, %v3023_v55  ;;  %v1738_v55 = vld [vmem:[%s3489_s2 + $0x8] sm:$0xff] }
 0x19b   : > { %v3137_v49 = vadd.f32 %v3056_v8, %v847_v50  ;;  %1752 = vperm.xlu1 %2417, %v1738_v55  }
 0x19c   : > { %2235 = vmatmul.msk.bf16.gmra.mxu0 %vm274_vm2, %v2339_v43 }
 0x19d   : > { %v1159_v0 = vpop.f32.mrf.mxu1 }
 0x1a0   : > { %v797_v19 = vpop.f32.mrf.mxu2  ;;  %v826_v9 = vpop.f32.mrf.mxu3 }
 0x1a1   : > { %v850_v58 = vadd.f32 %v797_v19, %v3004_v52  ;;  %v3152_v8 = vadd.f32 %v826_v9, %v2968_v38  ;;  %v938_v51 = vpop.f32.mrf.mxu0  ;;  %v3233_v9 = vld [vmem:[%s3488_s1 + $0x118] sm:$0xff] }
 0x1a2   : > { %v3155_v1 = vadd.f32 %v938_v51, %v3042_v53 }
 0x1a3   : > { %v3158_v61 = vadd.f32 %v3081_v56, %v850_v58  ;;  %v3174_v56 = vld [vmem:[%s3488_s1 + $0x108] sm:$0xff] }
 0x1a5   : > { %2227 = vmatmul.msk.bf16.gmra.mxu2 %vm274_vm2, %v2339_v43  ;;  %2231 = vmatmul.msk.bf16.gmra.mxu3 %vm274_vm2, %v2339_v43  ;;  %v1162_v53 = vpop.f32.mrf.mxu1 }
 0x1a8   : > { %v800_v32 = vpop.f32.mrf.mxu2  ;;  %v829_v7 = vpop.f32.mrf.mxu3 }
 0x1a9   : > { %v853_v52 = vadd.f32 %v800_v32, %v3018_v34  ;;  %v3164_v38 = vadd.f32 %v829_v7, %v2985_v57  ;;  %v1128_v4 = vpop.f32.mrf.mxu0  ;;  %2302 = vmatmul.msk.bf16.gmra.mxu1 %vm274_vm2, %v3174_v56 }
 0x1aa   : > { %v3167_v5 = vadd.f32 %v1128_v4, %v3058_v62  ;;  %v1740_v62 = vld [vmem:[%s3489_s2 + $0x18] sm:$0xff] }
 0x1ab   : > { %v3169_v25 = vadd.f32 %v965_v33, %v853_v52  ;;  %1762 = vperm.xlu1 %2417, %v1740_v62  }
 0x1ac   : > { %2297 = vmatmul.msk.bf16.vlgmr.msra.gmra.mxu0 %vm274_vm2, %v3142_v3 }
 0x1ad   : > { %v1164_v44 = vpop.f32.mrf.mxu1 }
 0x1b0   : > { %v802_v57 = vpop.f32.mrf.mxu2  ;;  %v831_v34 = vpop.f32.mrf.mxu3 }
 0x1b1   : > { %v856_v17 = vadd.f32 %v802_v57, %v3037_v47  ;;  %v3185_v63 = vadd.f32 %v831_v34, %v3006_v40  ;;  %v1130_v33 = vpop.f32.mrf.mxu0 }
 0x1b2   : > { %v3188_v20 = vadd.f32 %v1130_v33, %v3083_v59  ;;  %v3201_v59 = vld [vmem:[%s3488_s1 + $0x110] sm:$0xff] }
 0x1b3   : > { %v1021_v42 = vadd.f32 %v967_v54, %v856_v17 }
 0x1b5   : > { %2265 = vmatmul.msk.bf16.vlgmr.msrb.gmra.mxu2 %vm274_vm2, %v2993_v48  ;;  %2269 = vmatmul.msk.bf16.vlgmr.msra.gmra.mxu3 %vm274_vm2, %v2993_v48  ;;  %v1167_v16 = vpop.f32.mrf.mxu1 }
 0x1b8   : > { %v979_v30 = vpop.f32.mrf.mxu2  ;;  %v3217_v27 = vpop.f32.mrf.mxu3 }
 0x1b9   : > { %v1001_v39 = vadd.f32 %v979_v30, %v3051_v45  ;;  %v1133_v47 = vpop.f32.mrf.mxu0  ;;  %2303 = vmatmul.msk.bf16.gmra.mxu1 %vm274_vm2, %v3201_v59  ;;  %v1742_v45 = vld [vmem:[%s3489_s2 + $0x28] sm:$0xff] }
 0x1ba   : > { %v3196_v40 = vadd.f32 %v1133_v47, %v3099_v31  ;;  %v1739_v31 = vld [vmem:[%s3489_s2 + $0x10] sm:$0xff]  ;;  %1772 = vperm.xlu0 %2416, %v1742_v45  }
 0x1bb   : > { %v1179_v18 = vadd.f32 %v1157_v26, %v1001_v39  ;;  %1757 = vperm.xlu2 %2418, %v1739_v31  }
 0x1bc   : > { %2298 = vmatmul.msk.bf16.gmra.mxu0 %vm274_vm2, %v3174_v56 }
 0x1bd   : > { %v1169_v14 = vpop.f32.mrf.mxu1 }
 0x1c0   : > { %v981_v48 = vpop.f32.mrf.mxu2 }
 0x1c1   : > { %v1004_v54 = vadd.f32 %v981_v48, %v3076_v21  ;;  %v1135_v22 = vpop.f32.mrf.mxu0  ;;  %v1743_v21 = vld [vmem:[%s3489_s2 + $0x30] sm:$0xff] }
 0x1c2   : > { %v3215_v12 = vadd.f32 %v1135_v22, %v3116_v15  ;;  %1777 = vperm.xlu1 %2417, %v1743_v21  }
 0x1c3   : > { %v1182_v43 = vadd.f32 %v1159_v0, %v1004_v54 }
 0x1c5   : > { %2266 = vmatmul.msk.bf16.gmra.mxu2 %vm274_vm2, %v3028_v28  ;;  %2270 = vmatmul.msk.bf16.gmra.mxu3 %vm274_vm2, %v3028_v28  ;;  %v1172_v26 = vpop.f32.mrf.mxu1  ;;  %v3239_v28 = vpop.f32.mrf.mxu3 }
 0x1c8   : > { %v984_v13 = vpop.f32.mrf.mxu2 }
 0x1c9   : > { %v1007_v50 = vadd.f32 %v984_v13, %v3094_v41  ;;  %v1138_v35 = vpop.f32.mrf.mxu0  ;;  %2304 = vmatmul.msk.bf16.gmra.mxu1 %vm274_vm2, %v3233_v9 }
 0x1ca   : > { %v3228_v15 = vadd.f32 %v1138_v35, %v3137_v49  ;;  %v1741_v49 = vld [vmem:[%s3489_s2 + $0x20] sm:$0xff] }
 0x1cb   : > { %v1185_v19 = vadd.f32 %v1162_v53, %v1007_v50  ;;  %1767 = vperm.xlu2 %2418, %v1741_v49  }
 0x1cc   : > { %2299 = vmatmul.msk.bf16.gmra.mxu0 %vm274_vm2, %v3201_v59 }
 0x1cd   : > { %v1174_v0 = vpop.f32.mrf.mxu1  ;;  %v3252_v7 = vpop.f32.mrf.mxu3 }
 0x1d0   : > { %v986_v41 = vpop.f32.mrf.mxu2 }
 0x1d1   : > { %v1010_v55 = vadd.f32 %v986_v41, %v3111_v37  ;;  %v1140_v58 = vpop.f32.mrf.mxu0 }
 0x1d2   : > { %v3246_v51 = vadd.f32 %v1140_v58, %v3158_v61 }
 0x1d3   : > { %v1188_v32 = vadd.f32 %v1164_v44, %v1010_v55 }
 0x1d5   : > { %2267 = vmatmul.msk.bf16.gmra.mxu2 %vm274_vm2, %v3063_v2  ;;  %2271 = vmatmul.msk.bf16.gmra.mxu3 %vm274_vm2, %v3063_v2  ;;  %v1456_v57 = vpop.f32.mrf.mxu1  ;;  %v3261_v33 = vpop.f32.mrf.mxu3 }
 0x1d8   : > { %v989_v52 = vpop.f32.mrf.mxu2 }
 0x1d9   : > { %v1013_v4 = vadd.f32 %v989_v52, %v3131_v24  ;;  %v1143_v53 = vpop.f32.mrf.mxu0 }
 0x1da   : > { %v3256_v37 = vadd.f32 %v1143_v53, %v3169_v25  ;;  %v1744_v25 = vld [vmem:[%s3489_s2 + $0x38] sm:$0xff] }
 0x1db   : > { %v1191_v61 = vadd.f32 %v1167_v16, %v1013_v4  ;;  %1782 = vperm.xlu2 %2418, %v1744_v25  }
 0x1dc   : > { %2300 = vmatmul.msk.bf16.gmra.mxu0 %vm274_vm2, %v3233_v9 }
 0x1dd   : > { %v3265_v30 = vpop.f32.mrf.mxu1  ;;  %v3277_v16 = vpop.f32.mrf.mxu3 }
 0x1e0   : > { %v991_v34 = vpop.f32.mrf.mxu2 }
 0x1e1   : > { %v1016_v62 = vadd.f32 %v991_v34, %v3152_v8  ;;  %v1145_v17 = vpop.f32.mrf.mxu0 }
 0x1e2   : > { %v3263_v2 = vadd.f32 %v1145_v17, %v1021_v42 }
 0x1e3   : > { %v1194_v44 = vadd.f32 %v1169_v14, %v1016_v62 }
 0x1e5   : > { %2268 = vmatmul.msk.bf16.gmra.mxu2 %vm274_vm2, %v3104_v23  ;;  %2272 = vmatmul.msk.bf16.gmra.mxu3 %vm274_vm2, %v3104_v23  ;;  %v3279_v48 = vpop.f32.mrf.mxu1 }
 0x1e8   : > { %v994_v24 = vpop.f32.mrf.mxu2 }
 0x1e9   : > { %v1019_v8 = vadd.f32 %v994_v24, %v3164_v38  ;;  %v1336_v39 = vpop.f32.mrf.mxu0  ;;  %v3286_v38 = vpop.f32.mrf.mxu3 }
 0x1ea   : > { %v3275_v42 = vadd.f32 %v1336_v39, %v1179_v18 }
 0x1eb   : > { %v1197_v47 = vadd.f32 %v1172_v26, %v1019_v8 }
 0x1ed   : > { %v3288_v18 = vpop.f32.mrf.mxu1 }
 0x1f0   : > { %v996_v45 = vpop.f32.mrf.mxu2 }
 0x1f1   : > { %v1022_v31 = vadd.f32 %v996_v45, %v3185_v63  ;;  %v1338_v23 = vpop.f32.mrf.mxu0  ;;  %v3292_v50 = vpop.f32.mrf.mxu3 }
 0x1f2   : > { %v3282_v54 = vadd.f32 %v1338_v23, %v1182_v43  ;;  %v1180_v23 = vadd.f32 %v3239_v28, %v3040_v60  ;;  %v1183_v60 = vadd.f32 %v3252_v7, %v3054_v46  ;;  %v1186_v46 = vadd.f32 %v3261_v33, %v3079_v29 }
 0x1f3   : > { %v1200_v22 = vadd.f32 %v1174_v0, %v1022_v31 }
 0x1f5   : > { %2305 = vmatmul.msk.bf16.vlgmr.msra.gmra.mxu2 %vm274_vm2, %v3142_v3  ;;  %v3296_v43 = vpop.f32.mrf.mxu1 }
 0x1f8   : > { %v1278_v14 = vpop.f32.mrf.mxu2 }
 0x1f9   : > { %v1341_v13 = vpop.f32.mrf.mxu0  ;;  %v3300_v49 = vpop.f32.mrf.mxu3 }
 0x1fa   : > { %v3290_v21 = vadd.f32 %v1341_v13, %v1185_v19  ;;  %v3329_v31 = vpop.permute.xlu0 %1747 }
 0x1fd   : > { %v3304_v58 = vpop.f32.mrf.mxu1 }
 0x200   : > { %v1280_v35 = vpop.f32.mrf.mxu2 }
 0x201   : > { %v1343_v26 = vpop.f32.mrf.mxu0 }
 0x202   : > { %v3294_v63 = vadd.f32 %v1343_v26, %v1188_v32  ;;  %v1307_v32 = vpop.f32.mrf.mxu3 }
 0x205   : > { %2306 = vmatmul.msk.bf16.gmra.mxu2 %vm274_vm2, %v3174_v56  ;;  %v3310_v4 = vpop.f32.mrf.mxu1 }
 0x208   : > { %v1283_v3 = vpop.f32.mrf.mxu2 }
 0x209   : > { %v1346_v41 = vpop.f32.mrf.mxu0 }
 0x20a   : > { %v3302_v55 = vadd.f32 %v1346_v41, %v1191_v61  ;;  %v1309_v61 = vpop.f32.mrf.mxu3 }
 0x20d   : > { %v3318_v17 = vpop.f32.mrf.mxu1  ;;  %v3342_v41 = vpop.permute.xlu1 %1752 }
 0x210   : > { %v1285_v19 = vpop.f32.mrf.mxu2 }
 0x211   : > { %v1348_v0 = vpop.f32.mrf.mxu0 }
 0x212   : > { %v3306_v52 = vadd.f32 %v1348_v0, %v1194_v44  ;;  %v1177_v44 = vadd.f32 %v3217_v27, %v3021_v10  ;;  %v1312_v39 = vpop.f32.mrf.mxu3  ;;  %v1362_v0 = vadd.f32 %v1283_v3, %v1183_v60 }
 0x215   : > { %2307 = vmatmul.msk.bf16.gmra.mxu2 %vm274_vm2, %v3201_v59  ;;  %v1356_v59 = vadd.f32 %v1278_v14, %v1177_v44  ;;  %v1357_v44 = vadd.f32 %v1307_v32, %v3167_v5 }
 0x216   : > { %v1664_v27 = vpop.f32.mrf.mxu1 }
 0x217   : > { %v1534_v8 = vadd.f32 %v1456_v57, %v1356_v59  ;;  %v1540_v59 = vadd.f32 %v3279_v48, %v1362_v0 }
 0x218   : > { %v3312_v56 = vpop.f32.mrf.mxu2 }
 0x219   : > { %v1351_v53 = vpop.f32.mrf.mxu0 }
 0x21a   : > { %v3314_v34 = vadd.f32 %v1351_v53, %v1197_v47  ;;  %v1314_v28 = vpop.f32.mrf.mxu3 }
 0x220   : > { %v3316_v62 = vpop.f32.mrf.mxu2 }
 0x221   : > { %v1353_v24 = vpop.f32.mrf.mxu0 }
 0x222   : > { %v3322_v25 = vadd.f32 %v1353_v24, %v1200_v22  ;;  %v1359_v22 = vadd.f32 %v1280_v35, %v1180_v23  ;;  %v1666_v24 = vpop.f32.mrf.mxu1 }
 0x225   : > { %2308 = vmatmul.msk.bf16.gmra.mxu2 %vm274_vm2, %v3233_v9  ;;  %v1537_v9 = vadd.f32 %v3265_v30, %v1359_v22  ;;  %v1365_v22 = vadd.f32 %v1285_v19, %v1186_v46  ;;  %v3360_v19 = vpop.permute.xlu1 %1762 }
 0x227   : > { %v1543_v60 = vadd.f32 %v3288_v18, %v1365_v22 }
 0x228   : > { %v3327_v47 = vpop.f32.mrf.mxu2 }
 0x229   : > { %v1635_v45 = vpop.f32.mrf.mxu0 }
 0x22a   : > { %v1713_v10 = vadd.f32 %v1635_v45, %v1534_v8  ;;  %v1669_v32 = vpop.f32.mrf.mxu1 }
 0x22c   : > { %v1785_v14 = vadd.f32 %v3329_v31, %v1713_v10  ;;  %v3350_v10 = vpop.permute.xlu2 %1757 }
 0x22e   : > { %v1809_v13 = vmax.f32 %v1785_v14, 0.0  ;;  %v1317_v14 = vpop.f32.mrf.mxu3 }
 0x230   : > { %1833 = vst [vmem:[%s3337_s30] sm:$0xff] %v1809_v13  ;;  %v3340_v57 = vpop.f32.mrf.mxu2 }
 0x231   : > { %v1637_v26 = vpop.f32.mrf.mxu0 }
 0x232   : > { %v1716_v35 = vadd.f32 %v1637_v26, %v1537_v9  ;;  %v1360_v9 = vadd.f32 %v1309_v61, %v3188_v20  ;;  %v1671_v46 = vpop.f32.mrf.mxu1 }
 0x234   : > { %v1788_v53 = vadd.f32 %v3342_v41, %v1716_v35 }
 0x236   : > { %v1812_v30 = vmax.f32 %v1788_v53, 0.0  ;;  %v1319_v61 = vpop.f32.mrf.mxu3 }
 0x238   : > { %1837 = vst [vmem:[%s3337_s30 + $0x18] sm:$0xff] %v1812_v30  ;;  %v1485_v8 = vpop.f32.mrf.mxu2 }
 0x239   : > { %v1535_v45 = vadd.f32 %v1485_v8, %v1357_v44  ;;  %v1640_v23 = vpop.f32.mrf.mxu0 }
 0x23a   : > { %v1719_v7 = vadd.f32 %v1640_v23, %v1540_v59  ;;  %v1363_v59 = vadd.f32 %v1312_v39, %v3196_v40 }
 0x23b   : > { %v1714_v3 = vadd.f32 %v1664_v27, %v1535_v45  ;;  %v1189_v27 = vadd.f32 %v3277_v16, %v3097_v6 }
 0x23c   : > { %v1791_v13 = vadd.f32 %v3350_v10, %v1719_v7 }
 0x23d   : > { %v1786_v5 = vadd.f32 %v3329_v31, %v1714_v3  ;;  %v1368_v30 = vadd.f32 %v3312_v56, %v1189_v27  ;;  %v3371_v56 = vpop.permute.xlu2 %1767  ;;  %v1369_v27 = vadd.f32 %v1317_v14, %v3228_v15 }
 0x23e   : > { %v1815_v48 = vmax.f32 %v1791_v13, 0.0  ;;  %v1366_v13 = vadd.f32 %v1314_v28, %v3215_v12 }
 0x23f   : > { %v1810_v26 = vmax.f32 %v1786_v5, 0.0  ;;  %v1546_v45 = vadd.f32 %v3296_v43, %v1368_v30 }
 0x240   : > { %1840 = vst [vmem:[%s3337_s30 + $0x30] sm:$0xff] %v1815_v48  ;;  %v1487_v35 = vpop.f32.mrf.mxu2 }
 0x241   : > { %1834 = vst [vmem:[%s3337_s30 + $0x8] sm:$0xff] %v1810_v26  ;;  %v1538_v29 = vadd.f32 %v1487_v35, %v1360_v9  ;;  %v1642_v33 = vpop.f32.mrf.mxu0  ;;  %v1322_v9 = vpop.f32.mrf.mxu3 }
 0x242   : > { %v1722_v0 = vadd.f32 %v1642_v33, %v1543_v60  ;;  %v1674_v35 = vpop.f32.mrf.mxu1 }
 0x243   : > { %v1717_v53 = vadd.f32 %v1666_v24, %v1538_v29  ;;  %v1192_v24 = vadd.f32 %v3286_v38, %v3114_v36 }
 0x244   : > { %v1794_v20 = vadd.f32 %v3360_v19, %v1722_v0 }
 0x245   : > { %v1789_v18 = vadd.f32 %v3342_v41, %v1717_v53  ;;  %v1371_v40 = vadd.f32 %v3316_v62, %v1192_v24  ;;  %v1195_v62 = vadd.f32 %v3292_v50, %v3134_v11  ;;  %v3404_v24 = vpop.permute.xlu2 %1782 }
 0x246   : > { %v1818_v44 = vmax.f32 %v1794_v20, 0.0  ;;  %v3393_v20 = vpop.permute.xlu1 %1777 }
 0x247   : > { %v1813_v8 = vmax.f32 %v1789_v18, 0.0  ;;  %v1549_v48 = vadd.f32 %v3304_v58, %v1371_v40  ;;  %v1374_v12 = vadd.f32 %v3327_v47, %v1195_v62  ;;  %v1198_v47 = vadd.f32 %v3300_v49, %v3155_v1 }
 0x248   : > { %1843 = vst [vmem:[%s3337_s30 + $0x48] sm:$0xff] %v1818_v44  ;;  %v1490_v23 = vpop.f32.mrf.mxu2 }
 0x249   : > { %1838 = vst [vmem:[%s3337_s30 + $0x20] sm:$0xff] %v1813_v8  ;;  %v1541_v6 = vadd.f32 %v1490_v23, %v1363_v59  ;;  %v1645_v16 = vpop.f32.mrf.mxu0  ;;  %v1552_v53 = vadd.f32 %v3310_v4, %v1374_v12  ;;  %v1324_v44 = vpop.f32.mrf.mxu3  ;;  %v1377_v15 = vadd.f32 %v3340_v57, %v1198_v47  ;;  %v1372_v23 = vadd.f32 %v1319_v61, %v3246_v51 }
 0x24a   : > { %v1725_v7 = vadd.f32 %v1645_v16, %v1546_v45  ;;  %v1676_v4 = vpop.f32.mrf.mxu1 }
 0x24b   : > { %v1720_v3 = vadd.f32 %v1669_v32, %v1541_v6  ;;  %v3382_v32 = vpop.permute.xlu0 %1772  ;;  %v1555_v6 = vadd.f32 %v3318_v17, %v1377_v15  ;;  %v1375_v17 = vadd.f32 %v1322_v9, %v3256_v37 }
 0x24c   : > { %v1797_v39 = vadd.f32 %v3371_v56, %v1725_v7 }
 0x24d   : > { %v1792_v43 = vadd.f32 %v3350_v10, %v1720_v3 }
 0x24e   : > { %v1821_v22 = vmax.f32 %v1797_v39, 0.0 }
 0x24f   : > { %v1816_v5 = vmax.f32 %v1792_v43, 0.0 }
 0x250   : > { %1846 = vst [vmem:[%s3337_s30 + $0x60] sm:$0xff] %v1821_v22  ;;  %v1492_v26 = vpop.f32.mrf.mxu2 }
 0x251   : > { %1841 = vst [vmem:[%s3337_s30 + $0x38] sm:$0xff] %v1816_v5  ;;  %v1544_v36 = vadd.f32 %v1492_v26, %v1366_v13  ;;  %v1647_v38 = vpop.f32.mrf.mxu0  ;;  %v1514_v40 = vpop.f32.mrf.mxu3  ;;  %v1378_v26 = vadd.f32 %v1324_v44, %v3263_v2 }
 0x252   : > { %v1728_v60 = vadd.f32 %v1647_v38, %v1549_v48  ;;  %v1679_v61 = vpop.f32.mrf.mxu1  ;;  %v1536_v9 = vadd.f32 %v1514_v40, %v3275_v42 }
 0x253   : > { %v1723_v29 = vadd.f32 %v1671_v46, %v1544_v36 }
 0x254   : > { %v1800_v58 = vadd.f32 %v3382_v32, %v1728_v60 }
 0x255   : > { %v1795_v28 = vadd.f32 %v3360_v19, %v1723_v29 }
 0x256   : > { %v1824_v33 = vmax.f32 %v1800_v58, 0.0 }
 0x257   : > { %v1819_v0 = vmax.f32 %v1795_v28, 0.0 }
 0x258   : > { %1849 = vst [vmem:[%s3337_s30 + $0x78] sm:$0xff] %v1824_v33  ;;  %v1495_v30 = vpop.f32.mrf.mxu2 }
 0x259   : > { %1844 = vst [vmem:[%s3337_s30 + $0x50] sm:$0xff] %v1819_v0  ;;  %v1547_v11 = vadd.f32 %v1495_v30, %v1369_v27  ;;  %v1650_v50 = vpop.f32.mrf.mxu0  ;;  %v1516_v36 = vpop.f32.mrf.mxu3 }
 0x25a   : > { %v1731_v18 = vadd.f32 %v1650_v50, %v1552_v53  ;;  %v1681_v60 = vpop.f32.mrf.mxu1  ;;  %v1539_v0 = vadd.f32 %v1516_v36, %v3282_v54 }
 0x25b   : > { %v1726_v59 = vadd.f32 %v1674_v35, %v1547_v11 }
 0x25c   : > { %v1803_v14 = vadd.f32 %v3393_v20, %v1731_v18 }
 0x25d   : > { %v1798_v8 = vadd.f32 %v3371_v56, %v1726_v59 }
 0x25e   : > { %v1827_v45 = vmax.f32 %v1803_v14, 0.0 }
 0x25f   : > { %v1822_v46 = vmax.f32 %v1798_v8, 0.0 }
 0x260   : > { %1852 = vst [vmem:[%s3337_s30 + $0x90] sm:$0xff] %v1827_v45  ;;  %v1497_v16 = vpop.f32.mrf.mxu2 }
 0x261   : > { %1847 = vst [vmem:[%s3337_s30 + $0x68] sm:$0xff] %v1822_v46  ;;  %v1550_v1 = vadd.f32 %v1497_v16, %v1372_v23  ;;  %v1652_v49 = vpop.f32.mrf.mxu0  ;;  %v1519_v33 = vpop.f32.mrf.mxu3 }
 0x262   : > { %v1734_v57 = vadd.f32 %v1652_v49, %v1555_v6  ;;  %v1542_v47 = vadd.f32 %v1519_v33, %v3290_v21 }
 0x263   : > { %v1729_v7 = vadd.f32 %v1676_v4, %v1550_v1 }
 0x264   : > { %v1806_v3 = vadd.f32 %v3404_v24, %v1734_v57 }
 0x265   : > { %v1801_v39 = vadd.f32 %v3382_v32, %v1729_v7 }
 0x266   : > { %v1830_v51 = vmax.f32 %v1806_v3, 0.0 }
 0x267   : > { %v1825_v43 = vmax.f32 %v1801_v39, 0.0 }
 0x268   : > { %1855 = vst [vmem:[%s3337_s30 + $0xa8] sm:$0xff] %v1830_v51  ;;  %v1500_v22 = vpop.f32.mrf.mxu2 }
 0x269   : > { %1850 = vst [vmem:[%s3337_s30 + $0x80] sm:$0xff] %v1825_v43  ;;  %v1553_v13 = vadd.f32 %v1500_v22, %v1375_v17  ;;  %v1521_v42 = vpop.f32.mrf.mxu3 }
 0x26a   : > { %v1545_v15 = vadd.f32 %v1521_v42, %v3294_v63 }
 0x26b   : > { %v1732_v5 = vadd.f32 %v1679_v61, %v1553_v13 }
 0x26d   : > { %v1804_v48 = vadd.f32 %v3393_v20, %v1732_v5 }
 0x26f   : > { %v1828_v38 = vmax.f32 %v1804_v48, 0.0 }
 0x270   : > { %v1502_v62 = vpop.f32.mrf.mxu2 }
 0x271   : > { %1853 = vst [vmem:[%s3337_s30 + $0x98] sm:$0xff] %v1828_v38  ;;  %v1556_v35 = vadd.f32 %v1502_v62, %v1378_v26  ;;  %v1524_v54 = vpop.f32.mrf.mxu3 }
 0x272   : > { %v1548_v21 = vadd.f32 %v1524_v54, %v3302_v55 }
 0x273   : > { %v1735_v29 = vadd.f32 %v1681_v60, %v1556_v35 }
 0x275   : > { %v1807_v37 = vadd.f32 %v3404_v24, %v1735_v29 }
 0x277   : > { %v1831_v12 = vmax.f32 %v1807_v37, 0.0 }
 0x278   : > { %v1693_v58 = vpop.f32.mrf.mxu2 }
 0x279   : > { %1856 = vst [vmem:[%s3337_s30 + $0xb0] sm:$0xff] %v1831_v12  ;;  %v1715_v28 = vadd.f32 %v1693_v58, %v1536_v9  ;;  %v1526_v45 = vpop.f32.mrf.mxu3 }
 0x27a   : > { %v1551_v63 = vadd.f32 %v1526_v45, %v3306_v52 }
 0x27b   : > { %v1787_v2 = vadd.f32 %v3329_v31, %v1715_v28 }
 0x27d   : > { %v1811_v27 = vmax.f32 %v1787_v2, 0.0 }
 0x27f   : > { %1836 = vst.msk [vmem:[%s3337_s30 + $0x10] sm:$0xff] %vm1835_vm6, %v1811_v27 }
 0x280   : > { %v1695_v53 = vpop.f32.mrf.mxu2 }
 0x281   : > { %v1718_v30 = vadd.f32 %v1695_v53, %v1539_v0  ;;  %v1529_v1 = vpop.f32.mrf.mxu3 }
 0x282   : > { %v1554_v57 = vadd.f32 %v1529_v1, %v3314_v34 }
 0x283   : > { %v1790_v11 = vadd.f32 %v3342_v41, %v1718_v30 }
 0x285   : > { %v1814_v50 = vmax.f32 %v1790_v11, 0.0 }
 0x287   : > { %1839 = vst.msk [vmem:[%s3337_s30 + $0x28] sm:$0xff] %vm1835_vm6, %v1814_v50 }
 0x288   : > { %v1698_v18 = vpop.f32.mrf.mxu2 }
 0x289   : > { %v1721_v31 = vadd.f32 %v1698_v18, %v1542_v47 }
 0x28b   : > { %v1793_v44 = vadd.f32 %v3350_v10, %v1721_v31 }
 0x28d   : > { %v1817_v59 = vmax.f32 %v1793_v44, 0.0 }
 0x28f   : > { %1842 = vst.msk [vmem:[%s3337_s30 + $0x40] sm:$0xff] %vm1835_vm6, %v1817_v59 }
 0x290   : > { %v1700_v14 = vpop.f32.mrf.mxu2 }
 0x291   : > { %v1724_v41 = vadd.f32 %v1700_v14, %v1545_v15 }
 0x293   : > { %v1796_v4 = vadd.f32 %v3360_v19, %v1724_v41 }
 0x295   : > { %v1820_v8 = vmax.f32 %v1796_v4, 0.0 }
 0x297   : > { %1845 = vst.msk [vmem:[%s3337_s30 + $0x58] sm:$0xff] %vm1835_vm6, %v1820_v8 }
 0x298   : > { %v1703_v10 = vpop.f32.mrf.mxu2 }
 0x299   : > { %v1727_v23 = vadd.f32 %v1703_v10, %v1548_v21 }
 0x29b   : > { %v1799_v46 = vadd.f32 %v3371_v56, %v1727_v23  ;;  %v1531_v56 = vpop.f32.mrf.mxu3 }
 0x29d   : > { %v1823_v6 = vmax.f32 %v1799_v46, 0.0 }
 0x29f   : > { %1848 = vst.msk [vmem:[%s3337_s30 + $0x70] sm:$0xff] %vm1835_vm6, %v1823_v6 }
 0x2a0   : > { %v1705_v16 = vpop.f32.mrf.mxu2 }
 0x2a1   : > { %v1730_v19 = vadd.f32 %v1705_v16, %v1551_v63 }
 0x2a3   : > { %v1802_v55 = vadd.f32 %v3382_v32, %v1730_v19  ;;  %v1557_v32 = vadd.f32 %v1531_v56, %v3322_v25 }
 0x2a5   : > { %v1826_v49 = vmax.f32 %v1802_v55, 0.0 }
 0x2a7   : > { %1851 = vst.msk [vmem:[%s3337_s30 + $0x88] sm:$0xff] %vm1835_vm6, %v1826_v49 }
 0x2a8   : > { %v1708_v7 = vpop.f32.mrf.mxu2 }
 0x2a9   : > { %v1733_v3 = vadd.f32 %v1708_v7, %v1554_v57 }
 0x2ab   : > { %v1805_v52 = vadd.f32 %v3393_v20, %v1733_v3 }
 0x2ad   : > { %v1829_v40 = vmax.f32 %v1805_v52, 0.0 }
 0x2af   : > { %1854 = vst.msk [vmem:[%s3337_s30 + $0xa0] sm:$0xff] %vm1835_vm6, %v1829_v40 }
 0x2b0   : > { %v1710_v34 = vpop.f32.mrf.mxu2 }
 0x2b1   : > { %v1736_v39 = vadd.f32 %v1710_v34, %v1557_v32 }
 0x2b3   : > { %v1808_v51 = vadd.f32 %v3404_v24, %v1736_v39 }
 0x2b5   : > { %v1832_v20 = vmax.f32 %v1808_v51, 0.0 }
 0x2b7   : > { %1857 = vst.msk [vmem:[%s3337_s30 + $0xb8] sm:$0xff] %vm1835_vm6, %v1832_v20 }
 0x2b8   : > { %2446 = shalt.err (!%p2443_p5)
}
 0x2b9   : > { %s2504_s10 = smov 384   ;;  %s2505_s18 = smov 24  }
 0x2ba   : > { %2354 = dma.vmem_to_hbm [thread:$0]  (%p2566_p4), %s1875_s28, 3072, %s1877_s29, %s1859_s15, %s2504_s10, %s2504_s10, %s2505_s18  }
 0x2bb PF: > { %p2360_p6 = scmp.ge.s32.totalorder %s2497_s17, 2  ;;  %s1891_s19 = sand.u32 1, %s2477_s12  }
 0x2bc   : > { %s1892_s30 = scalar_lea.sflag [#allocation3], %s1891_s19 }
 0x2bd   : > { %p2357_p7 = pnand %p2360_p6, %p2573_p8 }
 0x2bf   : > { %p2358_p9 = pneg %p2357_p7 }
 0x2c1   : > { %2472 = dma.done.wait (%p2358_p9), %s1892_s30, 3072  }
 0x2c2   : > { %2474 = vsyncadd (%p2358_p9), %s1892_s30, 4294964224  ;;  %s16_s17 = sadd.s32 1, %s2497_s17   ;;  %s3493_s12 = smov %s2481_s13 }
 0x2c3   : > { %p13_p10 = scmp.ge.s32.totalorder %s16_s17, 4   ;;  %s3494_s13 = smov %s2485_s14 }
 0x2c4   : > { %s3495_s14 = smov %s2579_s25  ;;  %s3496_s15 = smov %s2493_s16 }
 0x2c5   : > { %s3497_s16 = smov %s3499_s20  ;;  %15 = sbr.rel (!%p13_p10) target bundleno = 4 (0x4), region = 84 }
 0x2ca   :  { %1898 = vsyncpa [#allocation3], 1 }
 0x2cb   :  { %1900 = vsyncpa [#allocation3 + $0x1], 1 }

</bundles_post_ra>
